<compile_context>
chip_gen: v6e
topology: v6e:2x2x1
jax: 0.10.0
libtpu: 0.0.40
codegen_flags: <defaults>
</compile_context>

<pallas_src>
import functools

import numpy as np
import jax
import jax.numpy as jnp
from jax.experimental import pallas as pl
from jax.experimental.pallas import tpu as pltpu


def _round_up(x, m):
    return (x + m - 1) // m * m


def _sbert_reg_kernel(i_tab_ref, j_tab_ref,          # scalar prefetch (SMEM)
                      row_ref, colT_ref, qrsq_ref, qcsq_ref, w_ref, b_ref,
                      score_ref, sim_hbm,             # outputs
                      ubuf, lbuf, sem):               # scratch
    tile = ubuf.shape[0]
    s = pl.program_id(0)
    i = i_tab_ref[s]
    j = j_tab_ref[s]

    x_row = row_ref[...]                    # (TILE, D) f32
    x_colT = colT_ref[...]                  # (D, TILE) f32  (pre-transposed)

    # Gram tile in MXU-native (M,K)x(K,N) orientation, explicit f32 precision.
    gram = jax.lax.dot_general(
        x_row, x_colT,
        dimension_numbers=(((1,), (0,)), ((), ())),
        preferred_element_type=jnp.float32,
        precision=jax.lax.Precision.HIGHEST)          # (TILE, TILE)

    # dist/2 = sqrt(0.25*|r|^2 + 0.25*|c|^2 - 0.5*<r,c>); clamp tiny negatives.
    half_d2 = qrsq_ref[...] + qcsq_ref[...] - 0.5 * gram
    half_dist = jnp.sqrt(jnp.maximum(half_d2, 0.0))
    sim = 1.0 - jnp.tanh(half_dist)         # == 2 / (1 + exp(dist)), one EUP op
    simT = sim.T                            # mirror tile for the (j, i) block

    # Wait for the previous step's writes before reusing the staging buffers.
    # (Placed after the matmul so the 2x1 MiB DMAs overlap the MXU work.)
    @pl.when(s > 0)
    def _():
        pltpu.make_async_copy(
            ubuf, sim_hbm.at[pl.ds(0, tile), pl.ds(0, tile)], sem.at[0]).wait()
        pltpu.make_async_copy(
            lbuf, sim_hbm.at[pl.ds(0, tile), pl.ds(0, tile)], sem.at[1]).wait()

    ubuf[...] = sim
    lbuf[...] = simT

    # Only diagonal tiles contain the global diagonal: force sim == 1 exactly
    # (matches torch.cdist's exact zero distance for self-pairs).
    @pl.when(i == j)
    def _():
        r = jax.lax.broadcasted_iota(jnp.int32, (tile, tile), 0)
        c = jax.lax.broadcasted_iota(jnp.int32, (tile, tile), 1)
        diag = r == c
        ubuf[...] = jnp.where(diag, 1.0, ubuf[...])
        lbuf[...] = jnp.where(diag, 1.0, lbuf[...])

    r0 = i * tile
    c0 = j * tile
    up_copy = pltpu.make_async_copy(
        ubuf, sim_hbm.at[pl.ds(r0, tile), pl.ds(c0, tile)], sem.at[0])
    lo_copy = pltpu.make_async_copy(
        lbuf, sim_hbm.at[pl.ds(c0, tile), pl.ds(r0, tile)], sem.at[1])
    up_copy.start()
    lo_copy.start()

    # pred_score: one (1, TILE) lane-dense block per row tile; the diagonal
    # step (j == i) is the first step of each row sweep, so write it there.
    @pl.when(i == j)
    def _():
        logits = jax.lax.dot_general(
            w_ref[...], x_row,
            dimension_numbers=(((1,), (1,)), ((), ())),
            preferred_element_type=jnp.float32,
            precision=jax.lax.Precision.HIGHEST)      # (1, TILE)
        logits = logits + b_ref[0, 0]
        score_ref[...] = 1.0 / (1.0 + jnp.exp(-logits))

    # Drain outstanding output DMAs on the final step.
    @pl.when(s == pl.num_programs(0) - 1)
    def _():
        up_copy.wait()
        lo_copy.wait()


@jax.jit
def mono_sbert_clustering_reg_forward(emb, fc1_w, fc1_b):
    """emb: (N, D) sentence embeddings; fc1_w: (1, D); fc1_b: (1,).

    Returns (pred_score (N,), sim_mat (N, N)), both float32.
    """
    N, D = emb.shape
    emb = emb.astype(jnp.float32)
    w = fc1_w.reshape(1, D).astype(jnp.float32)
    b = fc1_b.reshape(1, 1).astype(jnp.float32)

    # Tile selection: 512 for large N (~9 MiB pipelined VMEM; safe on v5e/v6e/
    # v7x scoped limits), 256 for mid-size N (fills the 256x256 MXU), 128 floor.
    # TODO(synk): per-chip tuning (v6e could take 768-1024 tiles + ~48 MiB VMEM).
    if N > 512:
        tile = 512
    elif N > 128:
        tile = 256
    else:
        tile = 128
    n_pad = _round_up(N, tile)
    if n_pad != N:
        emb_p = jnp.zeros((n_pad, D), jnp.float32).at[:N, :].set(emb)
    else:
        emb_p = emb
    embT = emb_p.T                                     # (D, n_pad) column operand

    # 0.25 * ||x||^2, pre-scaled so the kernel forms dist/2 directly.
    qsq = 0.25 * jnp.sum(emb_p * emb_p, axis=-1)       # (n_pad,)
    qrsq = qsq.reshape(n_pad, 1)
    qcsq = qsq.reshape(1, n_pad)

    n_blk = n_pad // tile
    iu, ju = np.triu_indices(n_blk)                    # row-major upper triangle
    nsteps = int(iu.size)
    i_tab = jnp.asarray(iu, dtype=jnp.int32)
    j_tab = jnp.asarray(ju, dtype=jnp.int32)

    cost = pl.CostEstimate(
        flops=2 * D * (tile * tile * nsteps + tile * n_blk),
        transcendentals=2 * tile * tile * nsteps + tile * n_blk,
        bytes_accessed=4 * (tile * D * (nsteps + n_blk)        # col tiles + row tiles
                            + 2 * n_pad * n_pad                # sim (tile + mirror)
                            + 3 * n_pad + D + 1),
    )

    grid_spec = pltpu.PrefetchScalarGridSpec(
        num_scalar_prefetch=2,
        grid=(nsteps,),
        in_specs=[
            pl.BlockSpec((tile, D), lambda s, it, jt: (it[s], 0)),   # row tile
            pl.BlockSpec((D, tile), lambda s, it, jt: (0, jt[s])),   # col tile (T)
            pl.BlockSpec((tile, 1), lambda s, it, jt: (it[s], 0)),   # 0.25*|r|^2
            pl.BlockSpec((1, tile), lambda s, it, jt: (0, jt[s])),   # 0.25*|c|^2
            pl.BlockSpec((1, D), lambda s, it, jt: (0, 0)),          # fc1 weight
            pl.BlockSpec((1, 1), lambda s, it, jt: (0, 0)),          # fc1 bias
        ],
        out_specs=(
            pl.BlockSpec((1, tile), lambda s, it, jt: (0, it[s])),   # score
            pl.BlockSpec(memory_space=pl.ANY),                       # sim (manual DMA)
        ),
        scratch_shapes=[
            pltpu.VMEM((tile, tile), jnp.float32),                   # upper tile stage
            pltpu.VMEM((tile, tile), jnp.float32),                   # mirror tile stage
            pltpu.SemaphoreType.DMA((2,)),
        ],
    )

    score_p, sim_p = pl.pallas_call(
        _sbert_reg_kernel,
        grid_spec=grid_spec,
        out_shape=(
            jax.ShapeDtypeStruct((1, n_pad), jnp.float32),
            jax.ShapeDtypeStruct((n_pad, n_pad), jnp.float32),
        ),
        compiler_params=pltpu.CompilerParams(
            dimension_semantics=("arbitrary",),    # sequential: output revisits + DMA chaining
            vmem_limit_bytes=32 * 1024 * 1024,
            has_side_effects=True,                 # sim is written only via manual DMA
        ),
        cost_estimate=cost,
    )(i_tab, j_tab, emb_p, embT, qrsq, qcsq, w, b)

    return score_p[0, :N], sim_p[:N, :N]


def _reference(emb, fc1_w, fc1_b):
    logits = jnp.dot(emb, fc1_w.T, precision=jax.lax.Precision.HIGHEST) + fc1_b
    score = jax.nn.sigmoid(logits).reshape(-1)
    diff = emb[:, None, :] - emb[None, :, :]
    dist = jnp.sqrt(jnp.sum(diff * diff, axis=-1))
    sim = 2.0 / (1.0 + jnp.exp(dist))
    return score, sim


def _check(key, N, D):
    k_emb, k_w, k_b = jax.random.split(key, 3)
    emb = jax.random.normal(k_emb, (N, D), dtype=jnp.float32)
    fc1_w = jax.random.normal(k_w, (1, D), dtype=jnp.float32) * 0.1
    fc1_b = jax.random.normal(k_b, (1,), dtype=jnp.float32) * 0.1

    pred_score, sim_mat = mono_sbert_clustering_reg_forward(emb, fc1_w, fc1_b)
    jax.block_until_ready((pred_score, sim_mat))

    ref_score, ref_sim = _reference(emb, fc1_w, fc1_b)
    assert pred_score.shape == (N,)
    assert sim_mat.shape == (N, N)
    assert jnp.allclose(pred_score, ref_score, atol=1e-5, rtol=1e-5)
    assert jnp.allclose(sim_mat, ref_sim, atol=1e-5, rtol=1e-5)


if __name__ == "__main__":
    key = jax.random.PRNGKey(0)
    k1, k2, k3 = jax.random.split(key, 3)

    # Tiny single-tile case, single-tile-with-padding case, and a multi-block
    # case (n_blk = 2 -> 3 triangular steps: diag tile, mirror write, revisited
    # score block, padded tail).
    _check(k1, N=8, D=32)
    _check(k2, N=200, D=64)
    _check(k3, N=300, D=64)

    # TODO(synk): SBERT tokenization + transformer encoding (self.emb_model) is
    # text-dependent and out of scope; the kernel starts from sentence embeddings.
    print("KERNEL_OK")
</pallas_src>

<mosaic_0001>
module attributes {stable_mosaic.version = 11 : i64} {
  func.func @_sbert_reg_kernel(%arg0: i32, %arg1: memref<1xi32, #tpu.memory_space<smem>>, %arg2: memref<1xi32, #tpu.memory_space<smem>>, %arg3: memref<128x32xf32, #tpu.memory_space<vmem>>, %arg4: memref<32x128xf32, #tpu.memory_space<vmem>>, %arg5: memref<128x1xf32, #tpu.memory_space<vmem>>, %arg6: memref<1x128xf32, #tpu.memory_space<vmem>>, %arg7: memref<1x32xf32, #tpu.memory_space<vmem>>, %arg8: memref<1x1xf32, #tpu.memory_space<vmem>>, %arg9: memref<1x128xf32, #tpu.memory_space<vmem>>, %arg10: memref<128x128xf32, #tpu.memory_space<any>>, %arg11: memref<128x128xf32, #tpu.memory_space<vmem>>, %arg12: memref<128x128xf32, #tpu.memory_space<vmem>>, %arg13: memref<2x!tpu.dma_semaphore, #tpu.memory_space<semaphore_mem>>) attributes {dimension_semantics = [#tpu.dimension_semantics<arbitrary>], iteration_bounds = array<i64: 1>, scalar_prefetch = 2 : i64, scratch_operands = 3 : i64, tpu.core_type = #tpu.core_type<tc>, window_params = [{transform_indices = @transform_0, window_bounds = array<i64: 128, 32>}, {transform_indices = @transform_1, window_bounds = array<i64: 32, 128>}, {transform_indices = @transform_2, window_bounds = array<i64: 128, 1>}, {transform_indices = @transform_3, window_bounds = array<i64: 1, 128>}, {pipeline_mode = #tpu.pipeline_mode<synchronous>, transform_indices = @transform_4, window_bounds = array<i64: 1, 32>}, {pipeline_mode = #tpu.pipeline_mode<synchronous>, transform_indices = @transform_5, window_bounds = array<i64: 1, 1>}, {transform_indices = @transform_6, window_bounds = array<i64: 1, 128>}, {}]} {
    %0 = arith.index_cast %arg0 : i32 to index
    %1 = memref.load %arg1[%0] : memref<1xi32, #tpu.memory_space<smem>>
    %2 = arith.index_cast %arg0 : i32 to index
    %3 = memref.load %arg2[%2] : memref<1xi32, #tpu.memory_space<smem>>
    %c0 = arith.constant 0 : index
    %c0_0 = arith.constant 0 : index
    %4 = vector.load %arg3[%c0, %c0_0] : memref<128x32xf32, #tpu.memory_space<vmem>>, vector<128x32xf32>
    %c0_1 = arith.constant 0 : index
    %c0_2 = arith.constant 0 : index
    %5 = vector.load %arg4[%c0_1, %c0_2] : memref<32x128xf32, #tpu.memory_space<vmem>>, vector<32x128xf32>
    %cst = arith.constant dense<0.000000e+00> : vector<128x128xf32>
    %6 = tpu.matmul %4, %5, %cst {dimension_numbers = #tpu.dot_dimension_numbers<[1], [0], [0], [1], [0, 0, 1, 1], [], []>, precision = #tpu.contract_precision<fp32>} : vector<128x32xf32>, vector<32x128xf32>, vector<128x128xf32> -> vector<128x128xf32>
    %c0_3 = arith.constant 0 : index
    %c0_4 = arith.constant 0 : index
    %7 = vector.load %arg5[%c0_3, %c0_4] : memref<128x1xf32, #tpu.memory_space<vmem>>, vector<128x1xf32>
    %c0_5 = arith.constant 0 : index
    %c0_6 = arith.constant 0 : index
    %8 = vector.load %arg6[%c0_5, %c0_6] : memref<1x128xf32, #tpu.memory_space<vmem>>, vector<1x128xf32>
    %9 = vector.broadcast %7 : vector<128x1xf32> to vector<128x128xf32>
    %10 = vector.broadcast %8 : vector<1x128xf32> to vector<128x128xf32>
    %11 = arith.addf %9, %10 : vector<128x128xf32>
    %cst_7 = arith.constant 5.000000e-01 : f32
    %12 = vector.broadcast %cst_7 : f32 to vector<128x128xf32>
    %13 = arith.mulf %12, %6 : vector<128x128xf32>
    %14 = arith.subf %11, %13 : vector<128x128xf32>
    %cst_8 = arith.constant 0.000000e+00 : f32
    %15 = vector.broadcast %cst_8 : f32 to vector<128x128xf32>
    %16 = arith.maximumf %14, %15 : vector<128x128xf32>
    %17 = math.sqrt %16 : vector<128x128xf32>
    %18 = math.tanh %17 : vector<128x128xf32>
    %cst_9 = arith.constant 1.000000e+00 : f32
    %19 = vector.broadcast %cst_9 : f32 to vector<128x128xf32>
    %20 = arith.subf %19, %18 : vector<128x128xf32>
    %21 = tpu.transpose %20, [1, 0] : vector<128x128xf32> -> vector<128x128xf32>
    %c0_i32 = arith.constant 0 : i32
    %22 = arith.cmpi sgt, %arg0, %c0_i32 : i32
    %23 = arith.extui %22 : i1 to i32
    %c0_i32_10 = arith.constant 0 : i32
    %24 = arith.cmpi ne, %23, %c0_i32_10 : i32
    scf.if %24 {
      %c0_i32_23 = arith.constant 0 : i32
      %c0_i32_24 = arith.constant 0 : i32
      %c0_i32_25 = arith.constant 0 : i32
      %44 = tpu.memref_slice %arg10[%c0_i32_24, %c0_i32_25] : memref<128x128xf32, #tpu.memory_space<any>> -> memref<128x128xf32, #tpu.memory_space<any>>
      %45 = tpu.memref_slice %arg13[%c0_i32_23] : memref<2x!tpu.dma_semaphore, #tpu.memory_space<semaphore_mem>> -> memref<1x!tpu.dma_semaphore, #tpu.memory_space<semaphore_mem>>
      %46 = tpu.memref_squeeze %45 : memref<1x!tpu.dma_semaphore, #tpu.memory_space<semaphore_mem>> -> memref<!tpu.dma_semaphore, #tpu.memory_space<semaphore_mem>>
      tpu.wait_dma2 semaphore(%46 : memref<!tpu.dma_semaphore, #tpu.memory_space<semaphore_mem>>) src(%arg11 : memref<128x128xf32, #tpu.memory_space<vmem>>) dst(%44 : memref<128x128xf32, #tpu.memory_space<any>>)
      %c1_i32_26 = arith.constant 1 : i32
      %c0_i32_27 = arith.constant 0 : i32
      %c0_i32_28 = arith.constant 0 : i32
      %47 = tpu.memref_slice %arg10[%c0_i32_27, %c0_i32_28] : memref<128x128xf32, #tpu.memory_space<any>> -> memref<128x128xf32, #tpu.memory_space<any>>
      %48 = tpu.memref_slice %arg13[%c1_i32_26] : memref<2x!tpu.dma_semaphore, #tpu.memory_space<semaphore_mem>> -> memref<1x!tpu.dma_semaphore, #tpu.memory_space<semaphore_mem>>
      %49 = tpu.memref_squeeze %48 : memref<1x!tpu.dma_semaphore, #tpu.memory_space<semaphore_mem>> -> memref<!tpu.dma_semaphore, #tpu.memory_space<semaphore_mem>>
      tpu.wait_dma2 semaphore(%49 : memref<!tpu.dma_semaphore, #tpu.memory_space<semaphore_mem>>) src(%arg12 : memref<128x128xf32, #tpu.memory_space<vmem>>) dst(%47 : memref<128x128xf32, #tpu.memory_space<any>>)
    } else {
    }
    %c0_11 = arith.constant 0 : index
    %c0_12 = arith.constant 0 : index
    %25 = vector.load %arg11[%c0_11, %c0_12] : memref<128x128xf32, #tpu.memory_space<vmem>>, vector<128x128xf32>
    tpu.vector_store %arg11[%c0_11, %c0_12], %20 {strides = array<i32>} : memref<128x128xf32, #tpu.memory_space<vmem>>, vector<128x128xf32>,
    %c0_13 = arith.constant 0 : index
    %c0_14 = arith.constant 0 : index
    %26 = vector.load %arg12[%c0_13, %c0_14] : memref<128x128xf32, #tpu.memory_space<vmem>>, vector<128x128xf32>
    tpu.vector_store %arg12[%c0_13, %c0_14], %21 {strides = array<i32>} : memref<128x128xf32, #tpu.memory_space<vmem>>, vector<128x128xf32>,
    %27 = arith.cmpi eq, %1, %3 : i32
    %28 = arith.extui %27 : i1 to i32
    %c0_i32_15 = arith.constant 0 : i32
    %29 = arith.cmpi ne, %28, %c0_i32_15 : i32
    scf.if %29 {
      %44 = tpu.iota {dimensions = array<i32: 0>} : vector<128x128xi32>
      %45 = tpu.iota {dimensions = array<i32: 1>} : vector<128x128xi32>
      %46 = arith.cmpi eq, %44, %45 : vector<128x128xi32>
      %c0_23 = arith.constant 0 : index
      %c0_24 = arith.constant 0 : index
      %47 = vector.load %arg11[%c0_23, %c0_24] : memref<128x128xf32, #tpu.memory_space<vmem>>, vector<128x128xf32>
      %cst_25 = arith.constant 1.000000e+00 : f32
      %48 = vector.broadcast %cst_25 : f32 to vector<128x128xf32>
      %49 = arith.select %46, %48, %47 : vector<128x128xi1>, vector<128x128xf32>
      %c0_26 = arith.constant 0 : index
      %c0_27 = arith.constant 0 : index
      %50 = vector.load %arg11[%c0_26, %c0_27] : memref<128x128xf32, #tpu.memory_space<vmem>>, vector<128x128xf32>
      tpu.vector_store %arg11[%c0_26, %c0_27], %49 {strides = array<i32>} : memref<128x128xf32, #tpu.memory_space<vmem>>, vector<128x128xf32>,
      %c0_28 = arith.constant 0 : index
      %c0_29 = arith.constant 0 : index
      %51 = vector.load %arg12[%c0_28, %c0_29] : memref<128x128xf32, #tpu.memory_space<vmem>>, vector<128x128xf32>
      %cst_30 = arith.constant 1.000000e+00 : f32
      %52 = vector.broadcast %cst_30 : f32 to vector<128x128xf32>
      %53 = arith.select %46, %52, %51 : vector<128x128xi1>, vector<128x128xf32>
      %c0_31 = arith.constant 0 : index
      %c0_32 = arith.constant 0 : index
      %54 = vector.load %arg12[%c0_31, %c0_32] : memref<128x128xf32, #tpu.memory_space<vmem>>, vector<128x128xf32>
      tpu.vector_store %arg12[%c0_31, %c0_32], %53 {strides = array<i32>} : memref<128x128xf32, #tpu.memory_space<vmem>>, vector<128x128xf32>,
    } else {
    }
    %c128_i32 = arith.constant 128 : i32
    %30 = arith.muli %1, %c128_i32 : i32
    %c128_i32_16 = arith.constant 128 : i32
    %31 = arith.muli %3, %c128_i32_16 : i32
    %c0_i32_17 = arith.constant 0 : i32
    %32 = tpu.memref_slice %arg10[%30, %31] : memref<128x128xf32, #tpu.memory_space<any>> -> memref<128x128xf32, #tpu.memory_space<any>>
    %33 = tpu.memref_slice %arg13[%c0_i32_17] : memref<2x!tpu.dma_semaphore, #tpu.memory_space<semaphore_mem>> -> memref<1x!tpu.dma_semaphore, #tpu.memory_space<semaphore_mem>>
    %34 = tpu.memref_squeeze %33 : memref<1x!tpu.dma_semaphore, #tpu.memory_space<semaphore_mem>> -> memref<!tpu.dma_semaphore, #tpu.memory_space<semaphore_mem>>
    tpu.enqueue_dma source(%arg11 : memref<128x128xf32, #tpu.memory_space<vmem>>) target(%32 : memref<128x128xf32, #tpu.memory_space<any>>) target_semaphore(%34 : memref<!tpu.dma_semaphore, #tpu.memory_space<semaphore_mem>>)
    %c1_i32 = arith.constant 1 : i32
    %35 = tpu.memref_slice %arg10[%31, %30] : memref<128x128xf32, #tpu.memory_space<any>> -> memref<128x128xf32, #tpu.memory_space<any>>
    %36 = tpu.memref_slice %arg13[%c1_i32] : memref<2x!tpu.dma_semaphore, #tpu.memory_space<semaphore_mem>> -> memref<1x!tpu.dma_semaphore, #tpu.memory_space<semaphore_mem>>
    %37 = tpu.memref_squeeze %36 : memref<1x!tpu.dma_semaphore, #tpu.memory_space<semaphore_mem>> -> memref<!tpu.dma_semaphore, #tpu.memory_space<semaphore_mem>>
    tpu.enqueue_dma source(%arg12 : memref<128x128xf32, #tpu.memory_space<vmem>>) target(%35 : memref<128x128xf32, #tpu.memory_space<any>>) target_semaphore(%37 : memref<!tpu.dma_semaphore, #tpu.memory_space<semaphore_mem>>)
    %38 = arith.cmpi eq, %1, %3 : i32
    %39 = arith.extui %38 : i1 to i32
    %c0_i32_18 = arith.constant 0 : i32
    %40 = arith.cmpi ne, %39, %c0_i32_18 : i32
    scf.if %40 {
      %c0_23 = arith.constant 0 : index
      %c0_24 = arith.constant 0 : index
      %44 = vector.load %arg7[%c0_23, %c0_24] : memref<1x32xf32, #tpu.memory_space<vmem>>, vector<1x32xf32>
      %cst_25 = arith.constant dense<0.000000e+00> : vector<1x128xf32>
      %45 = tpu.matmul %44, %4, %cst_25 {dimension_numbers = #tpu.dot_dimension_numbers<[1], [1], [0], [0], [0, 0, 1, 0], [], []>, precision = #tpu.contract_precision<fp32>} : vector<1x32xf32>, vector<128x32xf32>, vector<1x128xf32> -> vector<1x128xf32>
      %c0_26 = arith.constant 0 : index
      %c0_27 = arith.constant 0 : index
      %46 = vector.load %arg8[%c0_26, %c0_27] : memref<1x1xf32, #tpu.memory_space<vmem>>, vector<1x1xf32>
      %47 = vector.extract %46[0, 0] : f32 from vector<1x1xf32>
      %48 = vector.broadcast %47 : f32 to vector<1x128xf32>
      %49 = arith.addf %45, %48 : vector<1x128xf32>
      %cst_28 = arith.constant 0.000000e+00 : f32
      %50 = vector.broadcast %cst_28 : f32 to vector<1x128xf32>
      %51 = arith.subf %50, %49 : vector<1x128xf32>
      %52 = math.exp %51 : vector<1x128xf32>
      %cst_29 = arith.constant 1.000000e+00 : f32
      %53 = vector.broadcast %cst_29 : f32 to vector<1x128xf32>
      %54 = arith.addf %53, %52 : vector<1x128xf32>
      %cst_30 = arith.constant 1.000000e+00 : f32
      %55 = vector.broadcast %cst_30 : f32 to vector<1x128xf32>
      %56 = arith.divf %55, %54 : vector<1x128xf32>
      %c0_31 = arith.constant 0 : index
      %c0_32 = arith.constant 0 : index
      %57 = vector.load %arg9[%c0_31, %c0_32] : memref<1x128xf32, #tpu.memory_space<vmem>>, vector<1x128xf32>
      tpu.vector_store %arg9[%c0_31, %c0_32], %56 {strides = array<i32>} : memref<1x128xf32, #tpu.memory_space<vmem>>, vector<1x128xf32>,
    } else {
    }
    %c0_i32_19 = arith.constant 0 : i32
    %41 = arith.cmpi eq, %arg0, %c0_i32_19 : i32
    %42 = arith.extui %41 : i1 to i32
    %c0_i32_20 = arith.constant 0 : i32
    %c1_i32_21 = arith.constant 1 : i32
    %c0_i32_22 = arith.constant 0 : i32
    %43 = arith.cmpi ne, %42, %c0_i32_22 : i32
    scf.if %43 {
      %44 = tpu.memref_slice %arg10[%30, %31] : memref<128x128xf32, #tpu.memory_space<any>> -> memref<128x128xf32, #tpu.memory_space<any>>
      %45 = tpu.memref_slice %arg13[%c0_i32_20] : memref<2x!tpu.dma_semaphore, #tpu.memory_space<semaphore_mem>> -> memref<1x!tpu.dma_semaphore, #tpu.memory_space<semaphore_mem>>
      %46 = tpu.memref_squeeze %45 : memref<1x!tpu.dma_semaphore, #tpu.memory_space<semaphore_mem>> -> memref<!tpu.dma_semaphore, #tpu.memory_space<semaphore_mem>>
      tpu.wait_dma2 semaphore(%46 : memref<!tpu.dma_semaphore, #tpu.memory_space<semaphore_mem>>) src(%arg11 : memref<128x128xf32, #tpu.memory_space<vmem>>) dst(%44 : memref<128x128xf32, #tpu.memory_space<any>>)
      %47 = tpu.memref_slice %arg10[%31, %30] : memref<128x128xf32, #tpu.memory_space<any>> -> memref<128x128xf32, #tpu.memory_space<any>>
      %48 = tpu.memref_slice %arg13[%c1_i32_21] : memref<2x!tpu.dma_semaphore, #tpu.memory_space<semaphore_mem>> -> memref<1x!tpu.dma_semaphore, #tpu.memory_space<semaphore_mem>>
      %49 = tpu.memref_squeeze %48 : memref<1x!tpu.dma_semaphore, #tpu.memory_space<semaphore_mem>> -> memref<!tpu.dma_semaphore, #tpu.memory_space<semaphore_mem>>
      tpu.wait_dma2 semaphore(%49 : memref<!tpu.dma_semaphore, #tpu.memory_space<semaphore_mem>>) src(%arg12 : memref<128x128xf32, #tpu.memory_space<vmem>>) dst(%47 : memref<128x128xf32, #tpu.memory_space<any>>)
    } else {
    }
    return
  }
  func.func @transform_0(%arg0: i32, %arg1: memref<1xi32, #tpu.memory_space<smem>>, %arg2: memref<1xi32, #tpu.memory_space<smem>>) -> (i32, i32) {
    %0 = arith.index_cast %arg0 : i32 to index
    %1 = memref.load %arg1[%0] : memref<1xi32, #tpu.memory_space<smem>>
    %c0_i32 = arith.constant 0 : i32
    %c0_i32_0 = arith.constant 0 : i32
    return %1, %c0_i32 : i32, i32
  }
  func.func @transform_1(%arg0: i32, %arg1: memref<1xi32, #tpu.memory_space<smem>>, %arg2: memref<1xi32, #tpu.memory_space<smem>>) -> (i32, i32) {
    %0 = arith.index_cast %arg0 : i32 to index
    %1 = memref.load %arg2[%0] : memref<1xi32, #tpu.memory_space<smem>>
    %c0_i32 = arith.constant 0 : i32
    %c0_i32_0 = arith.constant 0 : i32
    return %c0_i32, %1 : i32, i32
  }
  func.func @transform_2(%arg0: i32, %arg1: memref<1xi32, #tpu.memory_space<smem>>, %arg2: memref<1xi32, #tpu.memory_space<smem>>) -> (i32, i32) {
    %0 = arith.index_cast %arg0 : i32 to index
    %1 = memref.load %arg1[%0] : memref<1xi32, #tpu.memory_space<smem>>
    %c0_i32 = arith.constant 0 : i32
    %c0_i32_0 = arith.constant 0 : i32
    return %1, %c0_i32 : i32, i32
  }
  func.func @transform_3(%arg0: i32, %arg1: memref<1xi32, #tpu.memory_space<smem>>, %arg2: memref<1xi32, #tpu.memory_space<smem>>) -> (i32, i32) {
    %0 = arith.index_cast %arg0 : i32 to index
    %1 = memref.load %arg2[%0] : memref<1xi32, #tpu.memory_space<smem>>
    %c0_i32 = arith.constant 0 : i32
    %c0_i32_0 = arith.constant 0 : i32
    return %c0_i32, %1 : i32, i32
  }
  func.func @transform_4(%arg0: i32, %arg1: memref<1xi32, #tpu.memory_space<smem>>, %arg2: memref<1xi32, #tpu.memory_space<smem>>) -> (i32, i32) {
    %c0_i32 = arith.constant 0 : i32
    %c0_i32_0 = arith.constant 0 : i32
    %c0_i32_1 = arith.constant 0 : i32
    return %c0_i32, %c0_i32_0 : i32, i32
  }
  func.func @transform_5(%arg0: i32, %arg1: memref<1xi32, #tpu.memory_space<smem>>, %arg2: memref<1xi32, #tpu.memory_space<smem>>) -> (i32, i32) {
    %c0_i32 = arith.constant 0 : i32
    %c0_i32_0 = arith.constant 0 : i32
    %c0_i32_1 = arith.constant 0 : i32
    return %c0_i32, %c0_i32_0 : i32, i32
  }
  func.func @transform_6(%arg0: i32, %arg1: memref<1xi32, #tpu.memory_space<smem>>, %arg2: memref<1xi32, #tpu.memory_space<smem>>) -> (i32, i32) {
    %0 = arith.index_cast %arg0 : i32 to index
    %1 = memref.load %arg1[%0] : memref<1xi32, #tpu.memory_space<smem>>
    %c0_i32 = arith.constant 0 : i32
    %c0_i32_0 = arith.constant 0 : i32
    return %c0_i32, %1 : i32, i32
  }
}

</mosaic_0001>

<bundles_post_ra>
// kernel: mono_sbert_clustering_reg_forward.1
= control target key start
LH: loop header
LB: loop body
LE: loop exit
PB: predicated region body
PF: predicated region fallthrough
CT: control target
= control target key end

     0   :  { %v3448_v1 = vmov 0   ;;  %vm4916_vm0 = vcmask 261120   ;;  %s4824_s1 = inlined_call_operand.<no memory space> [shape: s32[1], index: 1, kind: input, shape index: {}, may-alias: {0,1}]   ;;  %s4825_s6 = inlined_call_operand.vmem [shape: f32[1,32], index: 6, kind: input, shape index: {}]   ;;  %s4826_s7 = inlined_call_operand.<no memory space> [shape: f32[1,1], index: 7, kind: input, shape index: {}]   ;;  %s4827_s9 = inlined_call_operand.vmem [shape: f32[128,128], index: 9, kind: output, shape index: {1}]   ;;  %s4828_s0 = inlined_call_operand.<no memory space> [shape: s32[1], index: 0, kind: input, shape index: {}, may-alias: {0,1}]   ;;  %s4829_s3 = inlined_call_operand.vmem [shape: f32[32,128], index: 3, kind: input, shape index: {}]   ;;  %s4830_s2 = inlined_call_operand.vmem [shape: f32[128,32], index: 2, kind: input, shape index: {}]   ;;  %s4831_s8 = inlined_call_operand.vmem [shape: f32[1,128], index: 8, kind: output, shape index: {0}]   ;;  %s4832_s4 = inlined_call_operand.vmem [shape: f32[128,1], index: 4, kind: input, shape index: {}]   ;;  %s4833_s5 = inlined_call_operand.vmem [shape: f32[1,128], index: 5, kind: input, shape index: {}]  }
   0x1   :  { %v17_v0 = vstv %s4826_s7  ;;  %p92_p0 = scmp.lt.s32.totalorder %s4824_s1, 0  ;;  %s2733_s15 = sshll.u32 %s4828_s0, 4  ;;  %3374 = vset.pattern.permute.xlu0 %v3448_v1  ;;  %3375 = vset.pattern.permute.xlu1 %v3448_v1 }
   0x2   :  { %18 = vst [vmem:[#allocation8] sm:$0x1] %v17_v0  ;;  %p85_p1 = scmp.lt.s32.totalorder %s2733_s15, 15  ;;  %p111_p2 = scmp.lt.s32.totalorder %s4828_s0, 0 }
   0x3   :  { %s3516_s7 = scalar_select %p92_p0, %s4824_s1, 0 }
   0x4   :  { %s5097_s15 = smov (!%p85_p1, %s2733_s15), 15  ;;  %p2739_p3 = scmp.ne.s32.totalorder %s4828_s0, %s4824_s1 }
   0x5   :  { %s2735_s20 = sshll.u32 %s3516_s7, 3  ;;  %s2734_s24 = sshll.u32 %s5097_s15, 3 }
   0x6   :  { %s95_s23 = scalar_lea.vmem %s4829_s3, %s2735_s20  ;;  %s3530_s27 = scalar_lea.vmem %s4830_s2, %s2734_s24 }
   0x7   :  { %v136_v2 = vld [vmem:[%s95_s23 + $0x18] sm:$0xff]  ;;  %v135_v3 = vld [vmem:[%s95_s23 + $0x10] sm:$0xff]  ;;  %v134_v4 = vld [vmem:[%s95_s23 + $0x8] sm:$0xff]  ;;  %s3545_s2 = scalar_select %p111_p2, %s4828_s0, 0 }
   0x8   :  { %v3532_v5 = vand.u32 4294901760, %v136_v2  ;;  %v3534_v6 = vand.u32 4294901760, %v135_v3  ;;  %v3536_v7 = vand.u32 4294901760, %v134_v4  ;;  %v133_v8 = vld [vmem:[%s95_s23] sm:$0xff]  ;;  %v118_v12 = vld [vmem:[%s3530_s27 + $0x8] sm:$0xff]  ;;  %v119_v13 = vld [vmem:[%s3530_s27 + $0x10] sm:$0xff]  ;;  %s3583_s16 = scalar_lea.vmem %s4832_s4, %s2734_s24  ;;  %s108_s17 = scalar_lea.vmem %s4833_s5, %s3516_s7 }
   0x9   :  { %v117_v9 = vld [vmem:[%s3530_s27] sm:$0xff]  ;;  %v3548_v10 = vand.u32 4294901760, %v133_v8  ;;  %s113_s12 = scalar_lea.vmem %s4831_s8, %s3545_s2  ;;  %v142_v17 = vsel %vm4916_vm0, %v118_v12, 0  ;;  %v120_v18 = vld [vmem:[%s3530_s27 + $0x18] sm:$0xff]  ;;  %v145_v21 = vsel %vm4916_vm0, %v119_v13, 0  ;;  %v1318_v36 = vld [vmem:[%s3583_s16 + $0x10] sm:$0xff] }
   0xa   :  { %v139_v11 = vsel %vm4916_vm0, %v117_v9, 0  ;;  %2967 = vmatprep.subr.mxu0 %v3532_v5  ;;  %v3555_v14 = vsub.f32 %v136_v2, %v3532_v5  ;;  %v3564_v16 = vsub.f32 %v135_v3, %v3534_v6  ;;  %v3569_v19 = vand.u32 4294901760, %v142_v17  ;;  %v1316_v35 = vld [vmem:[%s3583_s16] sm:$0xff]  ;;  %v122_v42 = vld [vmem:[%s3530_s27 + $0x28] sm:$0xff]  ;;  %1345 = vperm.xlu1 %3375, %v1318_v36   ;;  %v123_v52 = vld [vmem:[%s3530_s27 + $0x30] sm:$0xff] }
   0xb   :  { %v3561_v15 = vand.u32 4294901760, %v139_v11  ;;  %2968 = vmatpush3.msra.mxu0 %v3532_v5  ;;  %v3572_v20 = vsub.f32 %v134_v4, %v3536_v7  ;;  %v3576_v22 = vsub.f32 %v133_v8, %v3548_v10  ;;  %v3595_v26 = vand.u32 4294901760, %v145_v21  ;;  %v121_v41 = vld [vmem:[%s3530_s27 + $0x20] sm:$0xff]  ;;  %1335 = vperm.xlu0 %3374, %v1316_v35   ;;  %v1317_v47 = vld [vmem:[%s3583_s16 + $0x8] sm:$0xff]  ;;  %v124_v53 = vld [vmem:[%s3530_s27 + $0x38] sm:$0xff] }
   0xc   :  { %4918 = vst [vmem:[#allocation14_spill] sm:$0xff] %v3569_v19  ;;  %2969 = vmatprep.subr.mxu0 %v3534_v6  ;;  %v3587_v23 = vand.u32 4294901760, %v3555_v14  ;;  %v3593_v25 = vand.u32 4294901760, %v3564_v16  ;;  %v3600_v27 = vsub.f32 %v142_v17, %v3569_v19  ;;  %v148_v30 = vsel %vm4916_vm0, %v120_v18, 0  ;;  %v125_v54 = vld [vmem:[%s3530_s27 + $0x40] sm:$0xff]  ;;  %v126_v63 = vld [vmem:[%s3530_s27 + $0x48] sm:$0xff] }
   0xd   :  { %4917 = vst [vmem:[#allocation13_spill] sm:$0xff] %v3561_v15  ;;  %v3590_v24 = vsub.f32 %v139_v11, %v3561_v15  ;;  %4920 = vst [vmem:[#allocation16_spill] sm:$0xff] %v3595_v26  ;;  %3007 = vmatprep.mubr.f32.mxu1 %v3561_v15  ;;  %2970 = vmatpush3.msra.mxu0 %v3534_v6  ;;  %v3603_v28 = vand.u32 4294901760, %v3572_v20  ;;  %v3606_v29 = vand.u32 4294901760, %v3576_v22  ;;  %v3630_v40 = vand.u32 4294901760, %v148_v30  ;;  %v127_v0 = vld [vmem:[%s3530_s27 + $0x50] sm:$0xff] }
   0xe   :  { %4921 = vst [vmem:[#allocation17_spill] sm:$0xff] %v3600_v27  ;;  %2971 = vmatprep.subr.mxu0 %v3536_v7  ;;  %v443_v31 = vsub.f32 %v3555_v14, %v3587_v23  ;;  %v450_v33 = vsub.f32 %v3564_v16, %v3593_v25  ;;  %v3618_v34 = vsub.f32 %v145_v21, %v3595_v26  ;;  %v3624_v37 = vand.u32 4294901760, %v3600_v27 }
   0xf   :  { %4919 = vst [vmem:[#allocation15_spill] sm:$0xff] %v3590_v24  ;;  %v3613_v32 = vand.u32 4294901760, %v3590_v24  ;;  %2972 = vmatpush3.msra.mxu0 %v3536_v7  ;;  %v457_v38 = vsub.f32 %v3572_v20, %v3603_v28  ;;  %v464_v39 = vsub.f32 %v3576_v22, %v3606_v29  ;;  %4925 = vst [vmem:[#allocation21_spill] sm:$0xff] %v3630_v40  ;;  %v151_v57 = vsel %vm4916_vm0, %v121_v41, 0 }
  0x10   :  { %4923 = vst [vmem:[#allocation19_spill] sm:$0xff] %v3618_v34  ;;  %4924 = vst [vmem:[#allocation20_spill] sm:$0xff] %v3624_v37  ;;  %v444_v43 = vand.u32 4294901760, %v443_v31  ;;  %2973 = vmatprep.subr.mxu0 %v3548_v10  ;;  %v451_v45 = vand.u32 4294901760, %v450_v33  ;;  %v3638_v46 = vand.u32 4294901760, %v3618_v34  ;;  %v268_v48 = vsub.f32 %v3600_v27, %v3624_v37  ;;  %1340 = vperm.xlu0 %3374, %v1317_v47  }
  0x11   :  { %4922 = vst [vmem:[#allocation18_spill] sm:$0xff] %v3613_v32  ;;  %v258_v44 = vsub.f32 %v3590_v24, %v3613_v32  ;;  %2974 = vmatpush3.msra.mxu0 %v3548_v10  ;;  %v458_v49 = vand.u32 4294901760, %v457_v38  ;;  %v465_v50 = vand.u32 4294901760, %v464_v39  ;;  %v3645_v51 = vsub.f32 %v148_v30, %v3630_v40  ;;  %v128_v30 = vld [vmem:[%s3530_s27 + $0x58] sm:$0xff] }
  0x12   :  { %4926 = vst [vmem:[#allocation22_spill] sm:$0xff] %v3638_v46  ;;  %2999 = vmatprep.subr.mxu1 %v444_v43  ;;  %v278_v56 = vsub.f32 %v3618_v34, %v3638_v46  ;;  %3031 = vmatprep.subr.mxu0 %v3555_v14  ;;  %v154_v58 = vsel %vm4916_vm0, %v122_v42, 0  ;;  %v3657_v59 = vand.u32 4294901760, %v268_v48  ;;  %v3662_v61 = vand.u32 4294901760, %v151_v57 }
  0x13   :  { %4927 = vst [vmem:[#allocation23_spill] sm:$0xff] %v3645_v51  ;;  %v3650_v55 = vand.u32 4294901760, %v258_v44  ;;  %3000 = vmatpush3.msra.mxu1 %v444_v43  ;;  %v3660_v60 = vand.u32 4294901760, %v3645_v51  ;;  %v3664_v62 = vand.u32 4294901760, %v154_v58  ;;  %v157_v2 = vsel %vm4916_vm0, %v123_v52, 0  ;;  %v129_v52 = vld [vmem:[%s3530_s27 + $0x60] sm:$0xff] }
  0x14   :  { %4929 = vst [vmem:[#allocation25_spill] sm:$0xff] %v3657_v59  ;;  %4931 = vst [vmem:[#allocation27_spill] sm:$0xff] %v3662_v61  ;;  %3001 = vmatprep.subr.mxu1 %v451_v45  ;;  %v3669_v1 = vand.u32 4294901760, %v278_v56  ;;  %v160_v3 = vsel %vm4916_vm0, %v124_v53, 0  ;;  %v163_v4 = vsel %vm4916_vm0, %v125_v54, 0  ;;  %v3678_v9 = vsub.f32 %v151_v57, %v3662_v61  ;;  %v130_v53 = vld [vmem:[%s3530_s27 + $0x68] sm:$0xff] }
  0x15   :  { %4928 = vst [vmem:[#allocation24_spill] sm:$0xff] %v3650_v55  ;;  %4930 = vst [vmem:[#allocation26_spill] sm:$0xff] %v3660_v60  ;;  %2975 = vmatprep.mubr.f32.mxu0 %v3650_v55  ;;  %3002 = vmatpush3.msra.mxu1 %v451_v45  ;;  %v288_v8 = vsub.f32 %v3645_v51, %v3660_v60  ;;  %v3681_v11 = vsub.f32 %v154_v58, %v3664_v62  ;;  %v3683_v12 = vand.u32 4294901760, %v157_v2 }
  0x16   :  { %4932 = vst [vmem:[#allocation28_spill] sm:$0xff] %v3664_v62  ;;  %4933 = vst [vmem:[#allocation29_spill] sm:$0xff] %v3669_v1  ;;  %2976 = vmatmul.mubr.f32.vlgmr.msra.gmra.mxu0 %v3657_v59  ;;  %3003 = vmatprep.subr.mxu1 %v458_v49  ;;  %v3686_v13 = vand.u32 4294901760, %v160_v3  ;;  %v3688_v17 = vand.u32 4294901760, %v163_v4  ;;  %v166_v18 = vsel %vm4916_vm0, %v126_v63, 0  ;;  %v169_v21 = vsel %vm4916_vm0, %v127_v0, 0 }
  0x17   :  { %4934 = vst [vmem:[#allocation30_spill] sm:$0xff] %v3678_v9  ;;  %4935 = vst [vmem:[#allocation31_spill] sm:$0xff] %v3681_v11  ;;  %2978 = vmatprep.mubr.f32.mxu0 %v3669_v1  ;;  %3004 = vmatpush3.msra.mxu1 %v458_v49  ;;  %v3693_v31 = vand.u32 4294901760, %v288_v8  ;;  %v3697_v33 = vand.u32 4294901760, %v3678_v9  ;;  %v3700_v35 = vand.u32 4294901760, %v3681_v11  ;;  %v3703_v36 = vsub.f32 %v157_v2, %v3683_v12 }
  0x18   :  { %4936 = vst [vmem:[#allocation32_spill] sm:$0xff] %v3683_v12  ;;  %4937 = vst [vmem:[#allocation33_spill] sm:$0xff] %v3686_v13  ;;  %3032 = vmatpush3.msra.mxu0 %v3555_v14  ;;  %3005 = vmatprep.subr.mxu1 %v465_v50  ;;  %v3707_v38 = vsub.f32 %v160_v3, %v3686_v13  ;;  %v3710_v39 = vsub.f32 %v163_v4, %v3688_v17  ;;  %v3712_v14 = vand.u32 4294901760, %v166_v18  ;;  %v131_v4 = vld [vmem:[%s3530_s27 + $0x70] sm:$0xff] }
  0x19   :  { %4938 = vst [vmem:[#allocation34_spill] sm:$0xff] %v3688_v17  ;;  %4939 = vst [vmem:[#allocation35_spill] sm:$0xff] %v3693_v31  ;;  %3033 = vmatprep.subr.mxu0 %v3564_v16  ;;  %v3714_v41 = vand.u32 4294901760, %v169_v21  ;;  %3006 = vmatpush3.msra.mxu1 %v465_v50  ;;  %v298_v42 = vsub.f32 %v3678_v9, %v3697_v33  ;;  %v308_v43 = vsub.f32 %v3681_v11, %v3700_v35 }
  0x1a   :  { %4940 = vst [vmem:[#allocation36_spill] sm:$0xff] %v3697_v33  ;;  %4941 = vst [vmem:[#allocation37_spill] sm:$0xff] %v3700_v35  ;;  %2979 = vmatmul.mubr.f32.gmra.mxu0 %v3693_v31  ;;  %v3722_v44 = vand.u32 4294901760, %v3703_v36  ;;  %v172_v45 = vsel %vm4916_vm0, %v128_v30, 0  ;;  %3008 = vmatmul.mubr.f32.vlgmr.msra.gmra.mxu1 %v3569_v19  ;;  %v3728_v47 = vand.u32 4294901760, %v3707_v38  ;;  %v3731_v48 = vand.u32 4294901760, %v3710_v39 }
  0x1b   :  { %4942 = vst [vmem:[#allocation38_spill] sm:$0xff] %v3703_v36  ;;  %4943 = vst [vmem:[#allocation39_spill] sm:$0xff] %v3707_v38  ;;  %3063 = vmatprep.subr.mxu1 %v3532_v5  ;;  %v3734_v49 = vsub.f32 %v166_v18, %v3712_v14  ;;  %v3737_v50 = vsub.f32 %v169_v21, %v3714_v41  ;;  %v3742_v54 = vand.u32 4294901760, %v298_v42  ;;  %v3744_v56 = vand.u32 4294901760, %v308_v43  ;;  %v132_v30 = vld [vmem:[%s3530_s27 + $0x78] sm:$0xff] }
  0x1c   :  { %4944 = vst [vmem:[#allocation40_spill] sm:$0xff] %v3710_v39  ;;  %4945 = vst [vmem:[#allocation41_spill] sm:$0xff] %v3712_v14  ;;  %3064 = vmatpush3.msra.mxu1 %v3532_v5  ;;  %3010 = vmatprep.mubr.f32.mxu1 %v3595_v26  ;;  %v318_v57 = vsub.f32 %v3703_v36, %v3722_v44  ;;  %v3749_v58 = vand.u32 4294901760, %v172_v45  ;;  %v328_v63 = vsub.f32 %v3707_v38, %v3728_v47 }
  0x1d   :  { %4946 = vst [vmem:[#allocation42_spill] sm:$0xff] %v3714_v41  ;;  %4947 = vst [vmem:[#allocation43_spill] sm:$0xff] %v3722_v44  ;;  %3034 = vmatpush3.msra.mxu0 %v3564_v16  ;;  %3065 = vmatprep.subr.mxu1 %v3534_v6  ;;  %v338_v0 = vsub.f32 %v3710_v39, %v3731_v48  ;;  %v3758_v2 = vand.u32 4294901760, %v3734_v49  ;;  %v3761_v3 = vand.u32 4294901760, %v3737_v50  ;;  %v175_v18 = vsel %vm4916_vm0, %v129_v52, 0 }
  0x1e   :  { %4948 = vst [vmem:[#allocation44_spill] sm:$0xff] %v3728_v47  ;;  %4949 = vst [vmem:[#allocation45_spill] sm:$0xff] %v3731_v48  ;;  %2981 = vmatprep.mubr.f32.mxu0 %v3742_v54  ;;  %v3765_v8 = vand.u32 4294901760, %v318_v57  ;;  %3066 = vmatpush3.msra.mxu1 %v3534_v6  ;;  %v3769_v16 = vsub.f32 %v172_v45, %v3749_v58  ;;  %v178_v21 = vsel %vm4916_vm0, %v130_v53, 0  ;;  %v3776_v42 = vand.u32 4294901760, %v328_v63 }
  0x1f   :  { %4950 = vst [vmem:[#allocation46_spill] sm:$0xff] %v3734_v49  ;;  %4951 = vst [vmem:[#allocation47_spill] sm:$0xff] %v3737_v50  ;;  %2982 = vmatmul.mubr.f32.gmra.mxu0 %v3744_v56  ;;  %3011 = vmatmul.mubr.f32.gmra.mxu1 %v3630_v40  ;;  %v3778_v43 = vand.u32 4294901760, %v338_v0  ;;  %v348_v57 = vsub.f32 %v3734_v49, %v3758_v2  ;;  %v358_v45 = vsub.f32 %v3737_v50, %v3761_v3 }
  0x20   :  { %4952 = vst [vmem:[#allocation48_spill] sm:$0xff] %v3742_v54  ;;  %4953 = vst [vmem:[#allocation49_spill] sm:$0xff] %v3744_v56  ;;  %2984 = vmatprep.mubr.f32.mxu0 %v3765_v8  ;;  %3013 = vmatprep.mubr.f32.mxu1 %v3662_v61  ;;  %v3787_v52 = vand.u32 4294901760, %v3769_v16  ;;  %v3789_v53 = vand.u32 4294901760, %v175_v18  ;;  %v3791_v55 = vand.u32 4294901760, %v178_v21  ;;  %v181_v63 = vsel %vm4916_vm0, %v131_v4, 0 }
  0x21   :  { %4954 = vst [vmem:[#allocation50_spill] sm:$0xff] %v3749_v58  ;;  %4955 = vst [vmem:[#allocation51_spill] sm:$0xff] %v3758_v2  ;;  %3035 = vmatprep.subr.mxu0 %v3572_v20  ;;  %3067 = vmatprep.subr.mxu1 %v3536_v7  ;;  %v3796_v0 = vand.u32 4294901760, %v181_v63  ;;  %v184_v59 = vsel %vm4916_vm0, %v132_v30, 0  ;;  %v3811_v4 = vand.u32 4294901760, %v348_v57 }
  0x22   :  { %4956 = vst [vmem:[#allocation52_spill] sm:$0xff] %v3761_v3  ;;  %4957 = vst [vmem:[#allocation53_spill] sm:$0xff] %v3765_v8  ;;  %3036 = vmatpush3.msra.mxu0 %v3572_v20  ;;  %3068 = vmatpush3.msra.mxu1 %v3536_v7  ;;  %v3802_v1 = vsub.f32 %v175_v18, %v3789_v53  ;;  %v3805_v31 = vsub.f32 %v178_v21, %v3791_v55  ;;  %v3807_v54 = vand.u32 4294901760, %v184_v59 }
  0x23   :  { %4958 = vst [vmem:[#allocation54_spill] sm:$0xff] %v3769_v16  ;;  %4959 = vst [vmem:[#allocation55_spill] sm:$0xff] %v3776_v42  ;;  %2985 = vmatmul.mubr.f32.gmra.mxu0 %v3776_v42  ;;  %3014 = vmatmul.mubr.f32.gmra.mxu1 %v3664_v62  ;;  %v368_v30 = vsub.f32 %v3769_v16, %v3787_v52  ;;  %v3816_v20 = vsub.f32 %v181_v63, %v3796_v0  ;;  %v3820_v18 = vand.u32 4294901760, %v358_v45 }
  0x24   :  { %4960 = vst [vmem:[#allocation56_spill] sm:$0xff] %v3778_v43  ;;  %4961 = vst [vmem:[#allocation57_spill] sm:$0xff] %v3787_v52  ;;  %2987 = vmatprep.mubr.f32.mxu0 %v3778_v43  ;;  %3016 = vmatprep.mubr.f32.mxu1 %v3683_v12  ;;  %v3823_v21 = vand.u32 4294901760, %v3802_v1  ;;  %v3826_v57 = vand.u32 4294901760, %v3805_v31  ;;  %v3829_v56 = vsub.f32 %v184_v59, %v3807_v54  ;;  %v1320_v43 = vld [vmem:[%s3583_s16 + $0x20] sm:$0xff]  ;;  %v1319_v12 = vld [vmem:[%s3583_s16 + $0x18] sm:$0xff] }
  0x25   :  { %4962 = vst [vmem:[#allocation58_spill] sm:$0xff] %v3789_v53  ;;  %4963 = vst [vmem:[#allocation59_spill] sm:$0xff] %v3791_v55  ;;  %v3832_v63 = vand.u32 4294901760, %v3816_v20  ;;  %3037 = vmatprep.subr.mxu0 %v3576_v22  ;;  %3069 = vmatprep.subr.mxu1 %v3548_v10  ;;  %v3842_v59 = vand.u32 4294901760, %v368_v30 }
  0x26   :  { %4964 = vst [vmem:[#allocation60_spill] sm:$0xff] %v3796_v0  ;;  %4965 = vst [vmem:[#allocation61_spill] sm:$0xff] %v3802_v1  ;;  %v378_v45 = vsub.f32 %v3802_v1, %v3823_v21  ;;  %3038 = vmatpush3.msra.mxu0 %v3576_v22  ;;  %3070 = vmatpush3.msra.mxu1 %v3548_v10  ;;  %v388_v8 = vsub.f32 %v3805_v31, %v3826_v57  ;;  %v3847_v42 = vand.u32 4294901760, %v3829_v56 }
  0x27   :  { %4966 = vst [vmem:[#allocation62_spill] sm:$0xff] %v3805_v31  ;;  %4967 = vst [vmem:[#allocation63_spill] sm:$0xff] %v3807_v54  ;;  %2988 = vmatmul.mubr.f32.gmra.mxu0 %v3811_v4  ;;  %3017 = vmatmul.mubr.f32.gmra.mxu1 %v3686_v13  ;;  %v398_v30 = vsub.f32 %v3816_v20, %v3832_v63 }
  0x28   :  { %4968 = vst [vmem:[#allocation64_spill] sm:$0xff] %v3811_v4  ;;  %4969 = vst [vmem:[#allocation65_spill] sm:$0xff] %v3816_v20  ;;  %2990 = vmatprep.mubr.f32.mxu0 %v3820_v18  ;;  %3019 = vmatprep.mubr.f32.mxu1 %v3688_v17  ;;  %v3853_v22 = vand.u32 4294901760, %v378_v45  ;;  %v3861_v4 = vand.u32 4294901760, %v388_v8  ;;  %v408_v45 = vsub.f32 %v3829_v56, %v3847_v42  ;;  %v1321_v17 = vld [vmem:[%s3583_s16 + $0x28] sm:$0xff]  ;;  %v1324_v8 = vld [vmem:[%s3583_s16 + $0x40] sm:$0xff] }
  0x29   :  { %4970 = vst [vmem:[#allocation66_spill] sm:$0xff] %v3820_v18  ;;  %4971 = vst [vmem:[#allocation67_spill] sm:$0xff] %v3823_v21  ;;  %3095 = vmatprep.subr.mxu0 %v3587_v23  ;;  %3127 = vmatprep.subr.mxu1 %v3532_v5  ;;  %v1322_v18 = vld [vmem:[%s3583_s16 + $0x30] sm:$0xff] }
  0x2a   :  { %4972 = vst [vmem:[#allocation68_spill] sm:$0xff] %v3826_v57  ;;  %4973 = vst [vmem:[#allocation69_spill] sm:$0xff] %v3829_v56  ;;  %1355 = vperm.xlu0 %3374, %v1320_v43   ;;  %1350 = vperm.xlu1 %3375, %v1319_v12   ;;  %v3869_v43 = vand.u32 4294901760, %v398_v30  ;;  %v3873_v12 = vand.u32 4294901760, %v408_v45  ;;  %v1328_v30 = vld [vmem:[%s3583_s16 + $0x60] sm:$0xff] }
  0x2b   :  { %4974 = vst [vmem:[#allocation70_spill] sm:$0xff] %v3832_v63  ;;  %4975 = vst [vmem:[#allocation71_spill] sm:$0xff] %v3842_v59  ;;  %2991 = vmatmul.mubr.f32.gmra.mxu0 %v3842_v59  ;;  %3020 = vmatmul.mubr.f32.gmra.mxu1 %v3712_v14  ;;  %v1323_v59 = vld [vmem:[%s3583_s16 + $0x38] sm:$0xff] }
  0x2c   :  { %4976 = vst [vmem:[#allocation72_spill] sm:$0xff] %v3847_v42  ;;  %4977 = vst [vmem:[#allocation73_spill] sm:$0xff] %v3853_v22  ;;  %2993 = vmatprep.mubr.f32.mxu0 %v3853_v22  ;;  %3022 = vmatprep.mubr.f32.mxu1 %v3714_v41 }
  0x2d   :  { %4978 = vst [vmem:[#allocation74_spill] sm:$0xff] %v3861_v4  ;;  %4979 = vst [vmem:[#allocation75_spill] sm:$0xff] %v3869_v43 }
  0x2e   :  { %1365 = vperm.xlu0 %3374, %v1322_v18   ;;  %1360 = vperm.xlu1 %3375, %v1321_v17   ;;  %4980 = vst [vmem:[#allocation76_spill] sm:$0xff] %v3873_v12  ;;  %v1326_v17 = vld [vmem:[%s3583_s16 + $0x50] sm:$0xff]  ;;  %v1325_v18 = vld [vmem:[%s3583_s16 + $0x48] sm:$0xff] }
  0x2f   :  { %2994 = vmatmul.mubr.f32.gmra.mxu0 %v3861_v4  ;;  %3023 = vmatmul.mubr.f32.gmra.mxu1 %v3749_v58 }
  0x30   :  { %2996 = vmatprep.mubr.f32.mxu0 %v3869_v43  ;;  %3025 = vmatprep.mubr.f32.mxu1 %v3789_v53 }
  0x32   :  { %1375 = vperm.xlu0 %3374, %v1324_v8   ;;  %1370 = vperm.xlu1 %3375, %v1323_v59  }
  0x33   :  { %2997 = vmatmul.mubr.f32.gmra.mxu0 %v3873_v12  ;;  %3026 = vmatmul.mubr.f32.gmra.mxu1 %v3791_v55 }
  0x34   :  { %3039 = vmatprep.mubr.f32.mxu0 %v3590_v24  ;;  %3028 = vmatprep.mubr.f32.mxu1 %v3796_v0 }
  0x36   :  { %1385 = vperm.xlu0 %3374, %v1326_v17   ;;  %1380 = vperm.xlu1 %3375, %v1325_v18  }
  0x37   :  { %3040 = vmatmul.mubr.f32.vlgmr.msra.gmra.mxu0 %v3600_v27  ;;  %3029 = vmatmul.mubr.f32.gmra.mxu1 %v3807_v54 }
  0x38   :  { %3042 = vmatprep.mubr.f32.mxu0 %v3618_v34  ;;  %3071 = vmatprep.mubr.f32.mxu1 %v3613_v32 }
  0x39   :  { %3096 = vmatpush3.msra.mxu0 %v3587_v23  ;;  %v1329_v23 = vld [vmem:[%s3583_s16 + $0x68] sm:$0xff] }
  0x3a   :  { %3097 = vmatprep.subr.mxu0 %v3593_v25  ;;  %1395 = vperm.xlu0 %3374, %v1328_v30  }
  0x3b   :  { %3043 = vmatmul.mubr.f32.gmra.mxu0 %v3645_v51  ;;  %3072 = vmatmul.mubr.f32.vlgmr.msra.gmra.mxu1 %v3624_v37 }
  0x3c   :  { %3128 = vmatpush3.msra.mxu1 %v3532_v5  ;;  %3045 = vmatprep.mubr.f32.mxu0 %v3678_v9  ;;  %v1327_v5 = vld [vmem:[%s3583_s16 + $0x58] sm:$0xff] }
  0x3d   :  { %3074 = vmatprep.mubr.f32.mxu1 %v3638_v46  ;;  %3098 = vmatpush3.msra.mxu0 %v3593_v25  ;;  %v4982_v25 = vld [vmem:[#allocation34_spill] sm:$0xff] }
  0x3e   :  { %3129 = vmatprep.subr.mxu1 %v3534_v6  ;;  %3099 = vmatprep.subr.mxu0 %v3603_v28 }
  0x3f   :  { %3046 = vmatmul.mubr.f32.gmra.mxu0 %v3681_v11  ;;  %3075 = vmatmul.mubr.f32.gmra.mxu1 %v3660_v60 }
  0x40   :  { %3048 = vmatprep.mubr.f32.mxu0 %v3703_v36  ;;  %3077 = vmatprep.mubr.f32.mxu1 %v3697_v33 }
  0x41   :  { %3130 = vmatpush3.msra.mxu1 %v3534_v6  ;;  %3100 = vmatpush3.msra.mxu0 %v3603_v28  ;;  %v1330_v6 = vld [vmem:[%s3583_s16 + $0x70] sm:$0xff] }
  0x42   :  { %3131 = vmatprep.subr.mxu1 %v3536_v7  ;;  %3101 = vmatprep.subr.mxu0 %v3606_v29 }
  0x43   :  { %3049 = vmatmul.mubr.f32.gmra.mxu0 %v3707_v38  ;;  %3078 = vmatmul.mubr.f32.gmra.mxu1 %v3700_v35 }
  0x44   :  { %3051 = vmatprep.mubr.f32.mxu0 %v3710_v39  ;;  %3080 = vmatprep.mubr.f32.mxu1 %v3722_v44 }
  0x45   :  { %3132 = vmatpush3.msra.mxu1 %v3536_v7  ;;  %3102 = vmatpush3.msra.mxu0 %v3606_v29  ;;  %v1331_v7 = vld [vmem:[%s3583_s16 + $0x78] sm:$0xff] }
  0x46   :  { %3133 = vmatprep.subr.mxu1 %v3548_v10  ;;  %1390 = vperm.xlu1 %3375, %v1327_v5  }
  0x47   :  { %3052 = vmatmul.mubr.f32.gmra.mxu0 %v3734_v49  ;;  %3081 = vmatmul.mubr.f32.gmra.mxu1 %v3728_v47 }
  0x48   :  { %3054 = vmatprep.mubr.f32.mxu0 %v3737_v50  ;;  %3083 = vmatprep.mubr.f32.mxu1 %v3731_v48 }
  0x49   :  { %3134 = vmatpush3.msra.mxu1 %v3548_v10  ;;  %1405 = vperm.xlu0 %3374, %v1330_v6   ;;  %v4981_v10 = vld [vmem:[#allocation32_spill] sm:$0xff] }
  0x4a   :  { %1400 = vperm.xlu1 %3375, %v1329_v23  }
  0x4b   :  { %3055 = vmatmul.mubr.f32.gmra.mxu0 %v3769_v16  ;;  %3084 = vmatmul.mubr.f32.gmra.mxu1 %v3758_v2 }
  0x4c   :  { %3057 = vmatprep.mubr.f32.mxu0 %v3802_v1  ;;  %3086 = vmatprep.mubr.f32.mxu1 %v3761_v3 }
  0x4e   :  { %1410 = vperm.xlu1 %3375, %v1331_v7  }
  0x4f   :  { %3058 = vmatmul.mubr.f32.gmra.mxu0 %v3805_v31  ;;  %3087 = vmatmul.mubr.f32.gmra.mxu1 %v3787_v52 }
  0x50   :  { %3060 = vmatprep.mubr.f32.mxu0 %v3816_v20  ;;  %3089 = vmatprep.mubr.f32.mxu1 %v3823_v21 }
  0x53   :  { %3061 = vmatmul.mubr.f32.gmra.mxu0 %v3829_v56  ;;  %3090 = vmatmul.mubr.f32.gmra.mxu1 %v3826_v57 }
  0x54   :  { %3103 = vmatprep.mubr.f32.mxu0 %v3561_v15  ;;  %3092 = vmatprep.mubr.f32.mxu1 %v3832_v63 }
  0x57   :  { %3104 = vmatmul.mubr.f32.vlgmr.msra.gmra.mxu0 %v3569_v19  ;;  %3093 = vmatmul.mubr.f32.gmra.mxu1 %v3847_v42 }
  0x58   :  { %3106 = vmatprep.mubr.f32.mxu0 %v3595_v26  ;;  %3135 = vmatprep.mubr.f32.mxu1 %v3561_v15 }
  0x5b   :  { %3107 = vmatmul.mubr.f32.gmra.mxu0 %v3630_v40  ;;  %3136 = vmatmul.mubr.f32.vlgmr.msra.gmra.mxu1 %v3569_v19 }
  0x5c   :  { %3109 = vmatprep.mubr.f32.mxu0 %v3662_v61  ;;  %3138 = vmatprep.mubr.f32.mxu1 %v3595_v26 }
  0x5f   :  { %3110 = vmatmul.mubr.f32.gmra.mxu0 %v3664_v62  ;;  %3139 = vmatmul.mubr.f32.gmra.mxu1 %v3630_v40 }
  0x60   :  { %3112 = vmatprep.mubr.f32.mxu0 %v4981_v10  ;;  %3141 = vmatprep.mubr.f32.mxu1 %v3662_v61 }
  0x63   :  { %3113 = vmatmul.mubr.f32.gmra.mxu0 %v3686_v13  ;;  %3142 = vmatmul.mubr.f32.gmra.mxu1 %v3664_v62 }
  0x64   :  { %3115 = vmatprep.mubr.f32.mxu0 %v4982_v25  ;;  %3144 = vmatprep.mubr.f32.mxu1 %v4981_v10 }
  0x67   :  { %3116 = vmatmul.mubr.f32.gmra.mxu0 %v3712_v14  ;;  %3145 = vmatmul.mubr.f32.gmra.mxu1 %v3686_v13 }
  0x68   :  { %3118 = vmatprep.mubr.f32.mxu0 %v3714_v41  ;;  %3147 = vmatprep.mubr.f32.mxu1 %v4982_v25 }
  0x6b   :  { %3119 = vmatmul.mubr.f32.gmra.mxu0 %v3749_v58  ;;  %3148 = vmatmul.mubr.f32.gmra.mxu1 %v3712_v14 }
  0x6c   :  { %3121 = vmatprep.mubr.f32.mxu0 %v3789_v53  ;;  %3150 = vmatprep.mubr.f32.mxu1 %v3714_v41 }
  0x6f   :  { %3122 = vmatmul.mubr.f32.gmra.mxu0 %v3791_v55  ;;  %3151 = vmatmul.mubr.f32.gmra.mxu1 %v3749_v58 }
  0x70   :  { %3124 = vmatprep.mubr.f32.mxu0 %v3796_v0  ;;  %3153 = vmatprep.mubr.f32.mxu1 %v3789_v53 }
  0x73   :  { %3125 = vmatmul.mubr.f32.gmra.mxu0 %v3807_v54  ;;  %3154 = vmatmul.mubr.f32.gmra.mxu1 %v3791_v55 }
  0x74   :  { %3156 = vmatprep.mubr.f32.mxu1 %v3796_v0 }
  0x77   :  { %3157 = vmatmul.mubr.f32.gmra.mxu1 %v3807_v54 }
  0x85   :  { %v1346_v60 = vpop.permute.xlu1 %1345 }
  0x86   :  { %v1336_v46 = vpop.permute.xlu0 %1335 }
  0x8b   :  { %v1341_v3 = vpop.permute.xlu0 %1340 }
  0xa5   :  { %v1351_v52 = vpop.permute.xlu1 %1350  ;;  %v1356_v34 = vpop.permute.xlu0 %1355 }
  0xa9   :  { %v1361_v51 = vpop.permute.xlu1 %1360  ;;  %v1366_v50 = vpop.permute.xlu0 %1365 }
  0xad   :  { %v1371_v16 = vpop.permute.xlu1 %1370  ;;  %v1376_v26 = vpop.permute.xlu0 %1375 }
  0xb1   :  { %v1381_v40 = vpop.permute.xlu1 %1380  ;;  %v1386_v22 = vpop.permute.xlu0 %1385 }
  0xc1   :  { %v1391_v53 = vpop.permute.xlu1 %1390 }
  0xd6   :  { %v3968_v28 = vpop.f32.mrf.mxu0 }
  0xd8   :  { %v3970_v29 = vpop.f32.mrf.mxu0 }
  0xda   :  { %v3972_v59 = vpop.f32.mrf.mxu0  ;;  %v3974_v45 = vpop.f32.mrf.mxu1 }
  0xdc   :  { %v3976_v8 = vpop.f32.mrf.mxu0  ;;  %v3978_v17 = vpop.f32.mrf.mxu1 }
  0xdf   :  { %v3980_v18 = vpop.f32.mrf.mxu0  ;;  %v3982_v30 = vpop.f32.mrf.mxu1 }
  0xe1   :  { %v3984_v5 = vpop.f32.mrf.mxu0  ;;  %v3986_v6 = vpop.f32.mrf.mxu1 }
  0xe3   :  { %v3988_v23 = vpop.f32.mrf.mxu0  ;;  %v3990_v7 = vpop.f32.mrf.mxu1 }
  0xe5   :  { %v3992_v10 = vpop.f32.mrf.mxu0  ;;  %v3994_v25 = vpop.f32.mrf.mxu1 }
  0xe7   :  { %v3996_v32 = vpop.f32.mrf.mxu0  ;;  %v3998_v37 = vpop.f32.mrf.mxu1 }
  0xe9   :  { %v4000_v33 = vpop.f32.mrf.mxu0  ;;  %v4002_v35 = vpop.f32.mrf.mxu1 }
  0xeb   :  { %v4004_v44 = vpop.f32.mrf.mxu0  ;;  %v4006_v47 = vpop.f32.mrf.mxu1 }
  0xed   :  { %v4008_v48 = vpop.f32.mrf.mxu0  ;;  %v4010_v2 = vpop.f32.mrf.mxu1 }
  0xef   :  { %v4012_v21 = vpop.f32.mrf.mxu0  ;;  %v4014_v57 = vpop.f32.mrf.mxu1 }
  0xf1   :  { %v4016_v63 = vpop.f32.mrf.mxu0  ;;  %v4018_v42 = vpop.f32.mrf.mxu1 }
  0xf3   :  { %v4020_v24 = vpop.f32.mrf.mxu0  ;;  %v4022_v27 = vpop.f32.mrf.mxu1 }
  0xf5   :  { %v4024_v9 = vpop.f32.mrf.mxu0  ;;  %v4026_v11 = vpop.f32.mrf.mxu1 }
  0xf6   :  { %4983 = vst [vmem:[#allocation77_spill] sm:$0xff] %v4024_v9 }
  0xf7   :  { %v3041_v36 = vpop.f32.mrf.mxu0  ;;  %v4028_v38 = vpop.f32.mrf.mxu1 }
  0xf9   :  { %v4030_v39 = vpop.f32.mrf.mxu0  ;;  %v4032_v49 = vpop.f32.mrf.mxu1 }
  0xfa   :  { %4984 = vst [vmem:[#allocation78_spill] sm:$0xff] %v4032_v49 }
  0xfb   :  { %v4034_v1 = vpop.f32.mrf.mxu0  ;;  %v4036_v31 = vpop.f32.mrf.mxu1 }
  0xfd   :  { %v4038_v20 = vpop.f32.mrf.mxu0  ;;  %v4040_v56 = vpop.f32.mrf.mxu1 }
  0xff   :  { %v4042_v15 = vpop.f32.mrf.mxu0  ;;  %v4044_v19 = vpop.f32.mrf.mxu1 }
 0x100   :  { %4985 = vst [vmem:[#allocation79_spill] sm:$0xff] %v4044_v19 }
 0x101   :  { %v4046_v61 = vpop.f32.mrf.mxu0  ;;  %v4048_v62 = vpop.f32.mrf.mxu1 }
 0x102   :  { %4986 = vst [vmem:[#allocation80_spill] sm:$0xff] %v4046_v61  ;;  %4987 = vst [vmem:[#allocation81_spill] sm:$0xff] %v4048_v62 }
 0x103   :  { %v4050_v13 = vpop.f32.mrf.mxu0  ;;  %v4052_v14 = vpop.f32.mrf.mxu1 }
 0x104   :  { %4988 = vst [vmem:[#allocation82_spill] sm:$0xff] %v4050_v13  ;;  %4989 = vst [vmem:[#allocation83_spill] sm:$0xff] %v4052_v14 }
 0x105   :  { %v4054_v41 = vpop.f32.mrf.mxu0  ;;  %v4056_v58 = vpop.f32.mrf.mxu1 }
 0x106   :  { %4990 = vst [vmem:[#allocation84_spill] sm:$0xff] %v4054_v41  ;;  %4991 = vst [vmem:[#allocation85_spill] sm:$0xff] %v4056_v58  ;;  %v1396_v41 = vpop.permute.xlu0 %1395  ;;  %v1401_v58 = vpop.permute.xlu1 %1400 }
 0x107   :  { %v4058_v4 = vpop.f32.mrf.mxu0  ;;  %v4060_v55 = vpop.f32.mrf.mxu1 }
 0x108   :  { %4992 = vst [vmem:[#allocation86_spill] sm:$0xff] %v4058_v4  ;;  %4993 = vst [vmem:[#allocation87_spill] sm:$0xff] %v4060_v55  ;;  %v2738_v4 = vld [vmem:[%s108_s17] ss:$0 sm:$0xff] }
 0x109   :  { %v4062_v43 = vpop.f32.mrf.mxu0  ;;  %v4064_v0 = vpop.f32.mrf.mxu1  ;;  %v4088_v62 = vadd.f32 %v2738_v4, %v1341_v3  ;;  %v4090_v61 = vadd.f32 %v2738_v4, %v1346_v60  ;;  %v4096_v9 = vadd.f32 %v2738_v4, %v1366_v50  ;;  %v4106_v3 = vadd.f32 %v2738_v4, %v1376_v26 }
 0x10a   :  { %4994 = vst [vmem:[#allocation88_spill] sm:$0xff] %v4062_v43  ;;  %4995 = vst [vmem:[#allocation89_spill] sm:$0xff] %v4064_v0  ;;  %v1406_v19 = vpop.permute.xlu0 %1405  ;;  %v1411_v49 = vpop.permute.xlu1 %1410  ;;  %v4108_v60 = vadd.f32 %v2738_v4, %v1371_v16  ;;  %v4116_v50 = vadd.f32 %v2738_v4, %v1381_v40  ;;  %v503_v26 = vadd.f32 %v3978_v17, %v3970_v29 }
 0x10b   :  { %v4066_v12 = vpop.f32.mrf.mxu0  ;;  %v4068_v54 = vpop.f32.mrf.mxu1  ;;  %5003 = vst [vmem:[#allocation97_spill] sm:$0xff] %v4090_v61  ;;  %5005 = vst [vmem:[#allocation99_spill] sm:$0xff] %v4096_v9  ;;  %v4110_v61 = vadd.f32 %v2738_v4, %v1386_v22  ;;  %v4118_v9 = vadd.f32 %v2738_v4, %v1396_v41  ;;  %v4126_v16 = vadd.f32 %v2738_v4, %v1401_v58 }
 0x10c   :  { %4996 = vst [vmem:[#allocation90_spill] sm:$0xff] %v4066_v12  ;;  %4997 = vst [vmem:[#allocation91_spill] sm:$0xff] %v4068_v54  ;;  %v4086_v54 = vadd.f32 %v2738_v4, %v1336_v46  ;;  %v509_v46 = vadd.f32 %v3974_v45, %v3968_v28  ;;  %v4128_v22 = vadd.f32 %v2738_v4, %v1411_v49 }
 0x10d   :  { %v4074_v14 = vpop.f32.mrf.mxu0  ;;  %v4076_v13 = vpop.f32.mrf.mxu1  ;;  %v521_v45 = vadd.f32 %v3982_v30, %v3972_v59  ;;  %v515_v40 = vadd.f32 %v3986_v6, %v3976_v8  ;;  %v533_v41 = vadd.f32 %v3990_v7, %v3980_v18  ;;  %v539_v49 = vadd.f32 %v4002_v35, %v3992_v10  ;;  %v5008_v30 = vld [vmem:[#allocation78_spill] sm:$0xff]  ;;  %v5010_v6 = vld [vmem:[#allocation80_spill] sm:$0xff]  ;;  %v5011_v7 = vld [vmem:[#allocation81_spill] sm:$0xff] }
 0x10e   :  { %4998 = vst [vmem:[#allocation92_spill] sm:$0xff] %v4074_v14  ;;  %4999 = vst [vmem:[#allocation93_spill] sm:$0xff] %v4076_v13  ;;  %v4092_v14 = vadd.f32 %v2738_v4, %v1356_v34  ;;  %v4094_v13 = vadd.f32 %v2738_v4, %v1351_v52  ;;  %v680_v28 = vadd.f32 %v3041_v36, %v509_v46 }
 0x10f   :  { %v4078_v55 = vpop.f32.mrf.mxu0  ;;  %v4080_v43 = vpop.f32.mrf.mxu1  ;;  %v545_v36 = vadd.f32 %v3998_v37, %v3988_v23  ;;  %v673_v58 = vadd.f32 %v4030_v39, %v503_v26  ;;  %v557_v29 = vadd.f32 %v4006_v47, %v3996_v32  ;;  %v551_v59 = vadd.f32 %v4010_v2, %v4000_v33 }
 0x110   :  { %5000 = vst [vmem:[#allocation94_spill] sm:$0xff] %v4078_v55  ;;  %5001 = vst [vmem:[#allocation95_spill] sm:$0xff] %v4080_v43  ;;  %v569_v8 = vadd.f32 %v4014_v57, %v4004_v44  ;;  %v563_v17 = vadd.f32 %v4018_v42, %v4008_v48  ;;  %v581_v35 = vadd.f32 %v4022_v27, %v4012_v21  ;;  %v5007_v57 = vld [vmem:[#allocation77_spill] sm:$0xff]  ;;  %v5009_v21 = vld [vmem:[#allocation79_spill] sm:$0xff] }
 0x111   :  { %v4082_v0 = vpop.f32.mrf.mxu0  ;;  %v4084_v12 = vpop.f32.mrf.mxu1  ;;  %5004 = vst [vmem:[#allocation98_spill] sm:$0xff] %v4092_v14  ;;  %v4120_v14 = vadd.f32 %v2738_v4, %v1391_v53  ;;  %v855_v39 = vadd.f32 %v4040_v56, %v673_v58  ;;  %v575_v33 = vadd.f32 %v4026_v11, %v4016_v63  ;;  %v593_v44 = vadd.f32 %v4028_v38, %v4020_v24  ;;  %v5012_v63 = vld [vmem:[#allocation82_spill] sm:$0xff]  ;;  %v5013_v24 = vld [vmem:[#allocation83_spill] sm:$0xff] }
 0x112   :  { %5002 = vst [vmem:[#allocation96_spill] sm:$0xff] %v4082_v0  ;;  %v4102_v0 = vadd.f32 %v2738_v4, %v1361_v51  ;;  %v4122_v51 = vadd.f32 %v2738_v4, %v1406_v19  ;;  %v527_v19 = vadd.f32 %v3994_v25, %v3984_v5  ;;  %v863_v4 = vadd.f32 %v4036_v31, %v680_v28 }
 0x113   :  { %v4098_v55 = vpop.f32.mrf.mxu0  ;;  %v4100_v43 = vpop.f32.mrf.mxu1  ;;  %v694_v31 = vadd.f32 %v4034_v1, %v521_v45  ;;  %v687_v47 = vadd.f32 %v4038_v20, %v515_v40  ;;  %v708_v48 = vadd.f32 %v4042_v15, %v533_v41  ;;  %v587_v27 = vadd.f32 %v5008_v30, %v5007_v57  ;;  %v5014_v15 = vld [vmem:[#allocation84_spill] sm:$0xff]  ;;  %v5015_v40 = vld [vmem:[#allocation85_spill] sm:$0xff]  ;;  %v5021_v30 = vld [vmem:[#allocation91_spill] sm:$0xff] }
 0x114   :  { %5006 = vst [vmem:[#allocation100_spill] sm:$0xff] %v4122_v51  ;;  %v701_v23 = vadd.f32 %v5010_v6, %v527_v19  ;;  %v722_v10 = vadd.f32 %v5012_v63, %v545_v36  ;;  %v715_v46 = vadd.f32 %v5014_v15, %v539_v49  ;;  %v5018_v19 = vld [vmem:[#allocation88_spill] sm:$0xff]  ;;  %v5019_v36 = vld [vmem:[#allocation89_spill] sm:$0xff]  ;;  %v5020_v49 = vld [vmem:[#allocation90_spill] sm:$0xff] }
 0x115   :  { %v4112_v34 = vpop.f32.mrf.mxu0  ;;  %v4114_v52 = vpop.f32.mrf.mxu1  ;;  %v879_v1 = vadd.f32 %v5009_v21, %v694_v31  ;;  %v871_v11 = vadd.f32 %v5011_v7, %v687_v47  ;;  %v895_v38 = vadd.f32 %v5013_v24, %v708_v48  ;;  %v729_v31 = vadd.f32 %v5018_v19, %v551_v59 }
 0x116   :  { %v887_v41 = vadd.f32 %v5015_v40, %v701_v23  ;;  %v903_v47 = vadd.f32 %v5019_v36, %v715_v46  ;;  %v5023_v23 = vld [vmem:[#allocation93_spill] sm:$0xff] }
 0x117   :  { %v3105_v53 = vpop.f32.mrf.mxu0  ;;  %v4138_v51 = vpop.f32.mrf.mxu1  ;;  %v919_v7 = vadd.f32 %v5023_v23, %v729_v31  ;;  %v5024_v24 = vld [vmem:[#allocation94_spill] sm:$0xff] }
 0x118   :  { %v1064_v32 = vadd.f32 %v3105_v53, %v863_v4  ;;  %v5016_v53 = vld [vmem:[#allocation86_spill] sm:$0xff]  ;;  %v5017_v4 = vld [vmem:[#allocation87_spill] sm:$0xff] }
 0x119   :  { %v1057_v37 = vpop.f32.mrf.mxu0  ;;  %v4154_v18 = vpop.f32.mrf.mxu1  ;;  %v736_v58 = vadd.f32 %v5016_v53, %v557_v29 }
 0x11a   :  { %v1058_v5 = vadd.f32 %v1057_v37, %v855_v39  ;;  %v911_v37 = vadd.f32 %v5017_v4, %v722_v10 }
 0x11b   :  { %v3108_v2 = vpop.f32.mrf.mxu0  ;;  %v3137_v42 = vpop.f32.mrf.mxu1  ;;  %v927_v21 = vadd.f32 %v5021_v30, %v736_v58 }
 0x11c   :  { %v1229_v56 = vadd.f32 %v3137_v42, %v1064_v32  ;;  %v1076_v26 = vadd.f32 %v3108_v2, %v879_v1  ;;  %v750_v2 = vadd.f32 %v5020_v49, %v569_v8  ;;  %v5022_v1 = vld [vmem:[#allocation92_spill] sm:$0xff] }
 0x11d   :  { %v1069_v20 = vpop.f32.mrf.mxu0  ;;  %v1222_v25 = vpop.f32.mrf.mxu1 }
 0x11e   :  { %v1436_v28 = vmul.f32 0.5, %v1229_v56  ;;  %v1223_v45 = vadd.f32 %v1222_v25, %v1058_v5  ;;  %v743_v5 = vadd.f32 %v5022_v1, %v563_v17  ;;  %v1070_v56 = vadd.f32 %v1069_v20, %v871_v11  ;;  %v5025_v25 = vld [vmem:[#allocation95_spill] sm:$0xff]  ;;  %v5028_v1 = vld [vmem:[#allocation98_spill] sm:$0xff] }
 0x11f   :  { %v3111_v39 = vpop.f32.mrf.mxu0  ;;  %v3140_v32 = vpop.f32.mrf.mxu1  ;;  %v943_v15 = vadd.f32 %v5025_v25, %v750_v2  ;;  %v5029_v25 = vld [vmem:[#allocation99_spill] sm:$0xff] }
 0x120   :  { %v1452_v48 = vsub.f32 %v4088_v62, %v1436_v28  ;;  %v1435_v42 = vmul.f32 0.5, %v1223_v45  ;;  %v1241_v57 = vadd.f32 %v3140_v32, %v1076_v26  ;;  %v764_v62 = vadd.f32 %v5024_v24, %v581_v35  ;;  %v5026_v45 = vld [vmem:[#allocation96_spill] sm:$0xff] }
 0x121   :  { %v1081_v29 = vpop.f32.mrf.mxu0  ;;  %v1234_v6 = vpop.f32.mrf.mxu1  ;;  %v1088_v46 = vadd.f32 %v3111_v39, %v895_v38  ;;  %v757_v40 = vadd.f32 %v5026_v45, %v575_v33  ;;  %v778_v39 = vadd.f32 %v4098_v55, %v593_v44 }
 0x122   :  { %v4184_v59 = vmax.f32 %v1452_v48, 0.0  ;;  %v1451_v63 = vsub.f32 %v4086_v54, %v1435_v42  ;;  %v1438_v10 = vmul.f32 0.5, %v1241_v57  ;;  %v1235_v8 = vadd.f32 %v1234_v6, %v1070_v56 }
 0x123   :  { %v3114_v26 = vpop.f32.mrf.mxu0  ;;  %v3143_v28 = vpop.f32.mrf.mxu1  ;;  %v1082_v20 = vadd.f32 %v1081_v29, %v887_v41  ;;  %v935_v54 = vadd.f32 %v4084_v12, %v743_v5  ;;  %v959_v32 = vadd.f32 %v4100_v43, %v764_v62  ;;  %v771_v12 = vadd.f32 %v4112_v34, %v587_v27 }
 0x124   :  { %3376 = vrsqrt.f32 %v4184_v59  ;;  %v4190_v17 = vmax.f32 %v1451_v63, 0.0  ;;  %v1454_v11 = vsub.f32 %v4094_v13, %v1438_v10  ;;  %v1437_v53 = vmul.f32 0.5, %v1235_v8  ;;  %v5027_v13 = vld [vmem:[#allocation97_spill] sm:$0xff] }
 0x125   :  { %v1253_v58 = vadd.f32 %v3143_v28, %v1088_v46  ;;  %v1093_v35 = vpop.f32.mrf.mxu0  ;;  %v1246_v4 = vpop.f32.mrf.mxu1  ;;  %v1100_v19 = vadd.f32 %v3114_v26, %v911_v37  ;;  %v951_v2 = vadd.f32 %v4114_v52, %v757_v40  ;;  %v4204_v30 = vadd.f32 %v4138_v51, %v778_v39 }
 0x126   :  { %3378 = vrsqrt.f32 %v4190_v17  ;;  %v4196_v38 = vmax.f32 %v1454_v11, 0.0  ;;  %v1247_v31 = vadd.f32 %v1246_v4, %v1082_v20  ;;  %v1453_v41 = vsub.f32 %v5027_v13, %v1437_v53 }
 0x127   :  { %v1440_v36 = vmul.f32 0.5, %v1253_v58  ;;  %v3117_v33 = vpop.f32.mrf.mxu0  ;;  %v3146_v48 = vpop.f32.mrf.mxu1  ;;  %v1094_v42 = vadd.f32 %v1093_v35, %v903_v47  ;;  %v4212_v27 = vadd.f32 %v4154_v18, %v771_v12  ;;  %vm1492_vm1 = vcmp.eq.f32.partialorder %v4184_v59, inf }
 0x128   :  { %v1439_v57 = vmul.f32 0.5, %v1247_v31  ;;  %v1265_v49 = vadd.f32 %v3146_v48, %v1100_v19  ;;  %v4206_v37 = vmax.f32 %v1453_v41, 0.0  ;;  %3380 = vrsqrt.f32 %v4196_v38 }
 0x129   :  { %v1456_v55 = vsub.f32 %v4102_v0, %v1440_v36  ;;  %v1105_v43 = vpop.f32.mrf.mxu0  ;;  %v1258_v44 = vpop.f32.mrf.mxu1  ;;  %v1112_v51 = vadd.f32 %v3117_v33, %v927_v21  ;;  %v1488_v62 = vand.u32 2147483648, %v4190_v17  ;;  %vm1485_vm2 = vcmp.eq.f32.partialorder %v4190_v17, inf }
 0x12a   :  { %v1455_v5 = vsub.f32 %v5028_v1, %v1439_v57  ;;  %v1442_v56 = vmul.f32 0.5, %v1265_v49  ;;  %v1259_v34 = vadd.f32 %v1258_v44, %v1094_v42  ;;  %3382 = vrsqrt.f32 %v4206_v37 }
 0x12b   :  { %v4215_v52 = vmax.f32 %v1456_v55, 0.0  ;;  %v3120_v47 = vpop.f32.mrf.mxu0  ;;  %v3149_v29 = vpop.f32.mrf.mxu1  ;;  %v1106_v63 = vadd.f32 %v1105_v43, %v919_v7  ;;  %vm1494_vm3 = vcmp.eq.f32.partialorder %v4184_v59, 0.0  ;;  %v1495_v11 = vand.u32 2147483648, %v4184_v59 }
 0x12c   :  { %v4217_v6 = vmax.f32 %v1455_v5, 0.0  ;;  %v1458_v0 = vsub.f32 %v4108_v60, %v1442_v56  ;;  %v1441_v23 = vmul.f32 0.5, %v1259_v34  ;;  %v1277_v10 = vadd.f32 %v3149_v29, %v1112_v51 }
 0x12d   :  { %3384 = vrsqrt.f32 %v4215_v52  ;;  %v1117_v18 = vpop.f32.mrf.mxu0  ;;  %v1270_v24 = vpop.f32.mrf.mxu1  ;;  %v1124_v8 = vadd.f32 %v3120_v47, %v943_v15  ;;  %v1502_v20 = vand.u32 2147483648, %v4206_v37  ;;  %vm1487_vm4 = vcmp.eq.f32.partialorder %v4190_v17, 0.0 }
 0x12e   :  { %3386 = vrsqrt.f32 %v4217_v6  ;;  %v4224_v21 = vmax.f32 %v1458_v0, 0.0  ;;  %v1457_v46 = vsub.f32 %v5029_v25, %v1441_v23  ;;  %v1444_v60 = vmul.f32 0.5, %v1277_v10 }
 0x12f   :  { %v1271_v26 = vadd.f32 %v1270_v24, %v1106_v63  ;;  %v3123_v28 = vpop.f32.mrf.mxu0  ;;  %v3152_v7 = vpop.f32.mrf.mxu1  ;;  %v1118_v40 = vadd.f32 %v1117_v18, %v935_v54  ;;  %v1509_v15 = vand.u32 2147483648, %v4196_v38  ;;  %vm1499_vm5 = vcmp.eq.f32.partialorder %v4206_v37, inf }
 0x130   :  { %v4231_v45 = vmax.f32 %v1457_v46, 0.0  ;;  %v1289_v53 = vadd.f32 %v3152_v7, %v1124_v8  ;;  %3388 = vrsqrt.f32 %v4224_v21  ;;  %v1460_v35 = vsub.f32 %v4116_v50, %v1444_v60 }
 0x131   :  { %v3377_v58 = vpop.eup %3376  ;;  %v1443_v4 = vmul.f32 0.5, %v1271_v26  ;;  %v1136_v19 = vadd.f32 %v3123_v28, %v959_v32  ;;  %v1129_v31 = vpop.f32.mrf.mxu0  ;;  %vm1501_vm6 = vcmp.eq.f32.partialorder %v4206_v37, 0.0  ;;  %v1516_v32 = vand.u32 2147483648, %v4217_v6 }
 0x132   :  { %v1282_v39 = vpop.f32.mrf.mxu1  ;;  %3390 = vrsqrt.f32 %v4231_v45  ;;  %v1446_v13 = vmul.f32 0.5, %v1289_v53  ;;  %v1130_v41 = vadd.f32 %v1129_v31, %v951_v2  ;;  %v4239_v33 = vmax.f32 %v1460_v35, 0.0 }
 0x133   :  { %v1283_v36 = vadd.f32 %v1282_v39, %v1118_v40  ;;  %v3379_v54 = vpop.eup %3378  ;;  %v1459_v48 = vsub.f32 %v4106_v3, %v1443_v4  ;;  %v3126_v12 = vpop.f32.mrf.mxu0  ;;  %v1491_v50 = vmul.f32 %v3377_v58, %v4184_v59  ;;  %vm1506_vm7 = vcmp.eq.f32.partialorder %v4196_v38, inf }
 0x134   :  { %v3155_v42 = vpop.f32.mrf.mxu1  ;;  %v1462_v57 = vsub.f32 %v4120_v14, %v1446_v13  ;;  %v1148_v2 = vadd.f32 %v3126_v12, %v4204_v30  ;;  %3392 = vrsqrt.f32 %v4239_v33  ;;  %v1484_v1 = vmul.f32 %v3379_v54, %v4190_v17 }
 0x135   :  { %v1445_v49 = vmul.f32 0.5, %v1283_v36  ;;  %v1301_v55 = vadd.f32 %v3155_v42, %v1136_v19  ;;  %v4249_v43 = vmax.f32 %v1459_v48, 0.0  ;;  %v1141_v3 = vpop.f32.mrf.mxu0  ;;  %v1493_v5 = vsel %vm1492_vm1, %v4184_v59, %v1491_v50  ;;  %v3381_v51 = vpop.eup %3380  ;;  %v5030_v19 = vld [vmem:[#allocation100_spill] sm:$0xff] }
 0x136   :  { %v1294_v44 = vpop.f32.mrf.mxu1  ;;  %vm1508_vm8 = vcmp.eq.f32.partialorder %v4196_v38, 0.0  ;;  %v4256_v14 = vmax.f32 %v1462_v57, 0.0  ;;  %v1142_v34 = vadd.f32 %v1141_v3, %v4212_v27  ;;  %vm1513_vm9 = vcmp.eq.f32.partialorder %v4217_v6, inf }
 0x137   :  { %v1461_v30 = vsub.f32 %v4110_v61, %v1445_v49  ;;  %v1448_v56 = vmul.f32 0.5, %v1301_v55  ;;  %3394 = vrsqrt.f32 %v4249_v43  ;;  %v1295_v47 = vadd.f32 %v1294_v44, %v1130_v41  ;;  %v3383_v61 = vpop.eup %3382 }
 0x138   :  { %v3158_v29 = vpop.f32.mrf.mxu1  ;;  %v1486_v0 = vsel %vm1485_vm2, %v4190_v17, %v1484_v1  ;;  %v1496_v23 = vsel %vm1494_vm3, %v1495_v11, %v1493_v5  ;;  %vm1515_vm10 = vcmp.eq.f32.partialorder %v4217_v6, 0.0  ;;  %3396 = vrsqrt.f32 %v4256_v14 }
 0x139   :  { %v4269_v27 = vmax.f32 %v1461_v30, 0.0  ;;  %v1464_v63 = vsub.f32 %v4126_v16, %v1448_v56  ;;  %v1313_v10 = vadd.f32 %v3158_v29, %v1148_v2  ;;  %v1447_v18 = vmul.f32 0.5, %v1295_v47 }
 0x13a   :  { %v1306_v24 = vpop.f32.mrf.mxu1  ;;  %v1489_v25 = vsel %vm1487_vm4, %v1488_v62, %v1486_v0  ;;  %3398 = vtanh.f32 %v1496_v23  ;;  %v1498_v59 = vmul.f32 %v3383_v61, %v4206_v37  ;;  %v3385_v46 = vpop.eup %3384  ;;  %v1505_v17 = vmul.f32 %v3381_v51, %v4196_v38 }
 0x13b   :  { %3400 = vrsqrt.f32 %v4269_v27  ;;  %v4278_v8 = vmax.f32 %v1464_v63, 0.0  ;;  %v1450_v60 = vmul.f32 0.5, %v1313_v10  ;;  %v1307_v26 = vadd.f32 %v1306_v24, %v1142_v34  ;;  %v3387_v28 = vpop.eup %3386 }
 0x13c   :  { %v1463_v16 = vsub.f32 %v4118_v9, %v1447_v18  ;;  %3402 = vtanh.f32 %v1489_v25  ;;  %v1500_v7 = vsel %vm1499_vm5, %v4206_v37, %v1498_v59  ;;  %v1507_v9 = vsel %vm1506_vm7, %v4196_v38, %v1505_v17 }
 0x13d   :  { %3404 = vrsqrt.f32 %v4278_v8  ;;  %v1466_v62 = vsub.f32 %v4128_v22, %v1450_v60  ;;  %v1449_v11 = vmul.f32 0.5, %v1307_v26  ;;  %v1503_v40 = vsel %vm1501_vm6, %v1502_v20, %v1500_v7  ;;  %v3389_v35 = vpop.eup %3388 }
 0x13e   :  { %v4291_v53 = vmax.f32 %v1463_v16, 0.0  ;;  %3406 = vtanh.f32 %v1503_v40  ;;  %v1512_v58 = vmul.f32 %v3387_v28, %v4217_v6  ;;  %v1510_v37 = vsel %vm1508_vm8, %v1509_v15, %v1507_v9 }
 0x13f   :  { %v4297_v4 = vmax.f32 %v1466_v62, 0.0  ;;  %v1465_v22 = vsub.f32 %v5030_v19, %v1449_v11  ;;  %v1519_v20 = vmul.f32 %v3385_v46, %v4215_v52  ;;  %v3391_v31 = vpop.eup %3390  ;;  %vm1520_vm11 = vcmp.eq.f32.partialorder %v4215_v52, inf }
 0x140   :  { %3408 = vrsqrt.f32 %v4291_v53  ;;  %v1514_v39 = vsel %vm1513_vm9, %v4217_v6, %v1512_v58  ;;  %vm1522_vm12 = vcmp.eq.f32.partialorder %v4215_v52, 0.0  ;;  %v1523_v41 = vand.u32 2147483648, %v4215_v52 }
 0x141   :  { %3410 = vrsqrt.f32 %v4297_v4  ;;  %v4312_v13 = vmax.f32 %v1465_v22, 0.0  ;;  %v1517_v38 = vsel %vm1515_vm10, %v1516_v32, %v1514_v39  ;;  %v1521_v15 = vsel %vm1520_vm11, %v4215_v52, %v1519_v20  ;;  %v3393_v54 = vpop.eup %3392 }
 0x142   :  { %3412 = vtanh.f32 %v1510_v37  ;;  %v1526_v36 = vmul.f32 %v3391_v31, %v4231_v45  ;;  %vm1527_vm13 = vcmp.eq.f32.partialorder %v4231_v45, inf  ;;  %vm1529_vm14 = vcmp.eq.f32.partialorder %v4231_v45, 0.0 }
 0x143   :  { %3414 = vrsqrt.f32 %v4312_v13  ;;  %v1530_v48 = vand.u32 2147483648, %v4231_v45  ;;  %v1533_v12 = vmul.f32 %v3389_v35, %v4224_v21  ;;  %v1524_v6 = vsel %vm1522_vm12, %v1523_v41, %v1521_v15 }
 0x144   :  { %3416 = vtanh.f32 %v1517_v38  ;;  %v1528_v42 = vsel %vm1527_vm13, %v4231_v45, %v1526_v36  ;;  %vm1534_vm15 = vcmp.eq.f32.partialorder %v4224_v21, inf  ;;  %v3395_v52 = vpop.eup %3394  ;;  %vm1536_vm1 = vcmp.eq.f32.partialorder %v4224_v21, 0.0 }
 0x145   :  { %3418 = vtanh.f32 %v1524_v6  ;;  %v1531_v50 = vsel %vm1529_vm14, %v1530_v48, %v1528_v42  ;;  %v1535_v32 = vsel %vm1534_vm15, %v4224_v21, %v1533_v12  ;;  %v3397_v57 = vpop.eup %3396  ;;  %v1537_v49 = vand.u32 2147483648, %v4224_v21 }
 0x146   :  { %3420 = vtanh.f32 %v1531_v50  ;;  %v1540_v2 = vmul.f32 %v3395_v52, %v4249_v43  ;;  %vm1541_vm2 = vcmp.eq.f32.partialorder %v4249_v43, inf  ;;  %vm1543_vm3 = vcmp.eq.f32.partialorder %v4249_v43, 0.0 }
 0x147   :  { %v3399_v55 = vpop.eup %3398  ;;  %v1544_v45 = vand.u32 2147483648, %v4249_v43  ;;  %v1547_v3 = vmul.f32 %v3393_v54, %v4239_v33  ;;  %vm1548_vm4 = vcmp.eq.f32.partialorder %v4239_v33, inf  ;;  %v1538_v5 = vsel %vm1536_vm1, %v1537_v49, %v1535_v32 }
 0x148   :  { %v3401_v44 = vpop.eup %3400  ;;  %v1612_v1 = vsub.f32 1.0, %v3399_v55  ;;  %v1542_v30 = vsel %vm1541_vm2, %v4249_v43, %v1540_v2  ;;  %vm1550_vm5 = vcmp.eq.f32.partialorder %v4239_v33, 0.0  ;;  %3422 = vtanh.f32 %v1538_v5 }
 0x149   :  { %v3403_v21 = vpop.eup %3402  ;;  %v1545_v56 = vsel %vm1543_vm3, %v1544_v45, %v1542_v30  ;;  %v1549_v34 = vsel %vm1548_vm4, %v4239_v33, %v1547_v3  ;;  %v1551_v51 = vand.u32 2147483648, %v4239_v33  ;;  %v1554_v0 = vmul.f32 %v3401_v44, %v4269_v27 }
 0x14a   :  { %v3405_v47 = vpop.eup %3404  ;;  %v1611_v29 = vsub.f32 1.0, %v3403_v21  ;;  %1670 = vst [vmem:[#allocation2] sm:$0xff] %v1612_v1  ;;  %3424 = vtanh.f32 %v1545_v56  ;;  %vm1555_vm6 = vcmp.eq.f32.partialorder %v4269_v27, inf  ;;  %vm1557_vm7 = vcmp.eq.f32.partialorder %v4269_v27, 0.0 }
 0x14b   :  { %v3407_v23 = vpop.eup %3406  ;;  %v1552_v61 = vsel %vm1550_vm5, %v1551_v51, %v1549_v34  ;;  %v1558_v43 = vand.u32 2147483648, %v4269_v27  ;;  %v1561_v63 = vmul.f32 %v3397_v57, %v4256_v14  ;;  %v1556_v33 = vsel %vm1555_vm6, %v4269_v27, %v1554_v0 }
 0x14c   :  { %1627 = vxpose.xlu0.b32.start [1/16] %v1611_v29, 128  ;;  %1669 = vst [vmem:[#allocation2 + $0x30] sm:$0xff] %v1611_v29  ;;  %v1613_v10 = vsub.f32 1.0, %v3407_v23  ;;  %3426 = vtanh.f32 %v1552_v61  ;;  %vm1562_vm8 = vcmp.eq.f32.partialorder %v4256_v14, inf  ;;  %v1565_v59 = vand.u32 2147483648, %v4256_v14 }
 0x14d   :  { %v3409_v18 = vpop.eup %3408  ;;  %v1559_v24 = vsel %vm1557_vm7, %v1558_v43, %v1556_v33  ;;  %v1563_v25 = vsel %vm1562_vm8, %v4256_v14, %v1561_v63  ;;  %vm1564_vm9 = vcmp.eq.f32.partialorder %v4256_v14, 0.0  ;;  %vm1569_vm10 = vcmp.eq.f32.partialorder %v4291_v53, inf }
 0x14e   :  { %v3411_v46 = vpop.eup %3410  ;;  %1671 = vst [vmem:[#allocation2 + $0x58] sm:$0xff] %v1613_v10  ;;  %3428 = vtanh.f32 %v1559_v24  ;;  %v1568_v60 = vmul.f32 %v3409_v18, %v4291_v53  ;;  %v1566_v28 = vsel %vm1564_vm9, %v1565_v59, %v1563_v25  ;;  %vm1571_vm11 = vcmp.eq.f32.partialorder %v4291_v53, 0.0 }
 0x14f   :  { %v3413_v26 = vpop.eup %3412  ;;  %v1572_v27 = vand.u32 2147483648, %v4291_v53  ;;  %v1575_v16 = vmul.f32 %v3405_v47, %v4278_v8  ;;  %3430 = vtanh.f32 %v1566_v28  ;;  %vm1576_vm12 = vcmp.eq.f32.partialorder %v4278_v8, inf }
 0x150   :  { %v3415_v7 = vpop.eup %3414  ;;  %1628 = vxpose.xlu0.b32.cont [2/16] %v1612_v1, 128  ;;  %v1614_v17 = vsub.f32 1.0, %v3413_v26  ;;  %v1570_v62 = vsel %vm1569_vm10, %v4291_v53, %v1568_v60  ;;  %v1579_v9 = vand.u32 2147483648, %v4278_v8  ;;  %vm1578_vm13 = vcmp.eq.f32.partialorder %v4278_v8, 0.0 }
 0x151   :  { %v3417_v14 = vpop.eup %3416  ;;  %v1573_v11 = vsel %vm1571_vm11, %v1572_v27, %v1570_v62  ;;  %v1577_v40 = vsel %vm1576_vm12, %v4278_v8, %v1575_v16  ;;  %v1582_v58 = vmul.f32 %v3415_v7, %v4312_v13  ;;  %vm1583_vm14 = vcmp.eq.f32.partialorder %v4312_v13, inf }
 0x152   :  { %v3419_v35 = vpop.eup %3418  ;;  %1672 = vst [vmem:[#allocation2 + $0x18] sm:$0xff] %v1614_v17  ;;  %v1615_v19 = vsub.f32 1.0, %v3417_v14  ;;  %3432 = vtanh.f32 %v1573_v11  ;;  %v1580_v37 = vsel %vm1578_vm13, %v1579_v9, %v1577_v40  ;;  %v1586_v31 = vand.u32 2147483648, %v4312_v13 }
 0x153   :  { %v3421_v22 = vpop.eup %3420  ;;  %v1616_v53 = vsub.f32 1.0, %v3419_v35  ;;  %v1584_v20 = vsel %vm1583_vm14, %v4312_v13, %v1582_v58  ;;  %3434 = vtanh.f32 %v1580_v37  ;;  %vm1585_vm15 = vcmp.eq.f32.partialorder %v4312_v13, 0.0 }
 0x154   :  { %1629 = vxpose.xlu0.b32.cont [3/16] %v1613_v10, 128  ;;  %1673 = vst [vmem:[#allocation2 + $0x50] sm:$0xff] %v1615_v19  ;;  %v1617_v39 = vsub.f32 1.0, %v3421_v22  ;;  %v1589_v38 = vmul.f32 %v3411_v46, %v4297_v4  ;;  %v1587_v15 = vsel %vm1585_vm15, %v1586_v31, %v1584_v20  ;;  %vm1590_vm1 = vcmp.eq.f32.partialorder %v4297_v4, inf }
 0x155   :  { %1674 = vst [vmem:[#allocation2 + $0x68] sm:$0xff] %v1616_v53  ;;  %v1593_v8 = vand.u32 2147483648, %v4297_v4  ;;  %v3423_v41 = vpop.eup %3422  ;;  %3436 = vtanh.f32 %v1587_v15  ;;  %vm1592_vm2 = vcmp.eq.f32.partialorder %v4297_v4, 0.0 }
 0x156   :  { %1675 = vst [vmem:[#allocation2 + $0x8] sm:$0xff] %v1617_v39  ;;  %v1591_v36 = vsel %vm1590_vm1, %v4297_v4, %v1589_v38  ;;  %v1618_v48 = vsub.f32 1.0, %v3423_v41 }
 0x157   :  { %v3425_v54 = vpop.eup %3424  ;;  %v1594_v12 = vsel %vm1592_vm2, %v1593_v8, %v1591_v36 }
 0x158   :  { %1630 = vxpose.xlu0.b32.cont [4/16] %v1614_v17, 128  ;;  %v1619_v13 = vsub.f32 1.0, %v3425_v54  ;;  %3438 = vtanh.f32 %v1594_v12  ;;  %1676 = vst [vmem:[#allocation2 + $0x48] sm:$0xff] %v1618_v48 }
 0x159   :  { %v3427_v6 = vpop.eup %3426 }
 0x15a   :  { %1677 = vst [vmem:[#allocation2 + $0x40] sm:$0xff] %v1619_v13  ;;  %v1620_v42 = vsub.f32 1.0, %v3427_v6 }
 0x15b   :  { %v3429_v52 = vpop.eup %3428 }
 0x15c   :  { %1631 = vxpose.xlu0.b32.cont [5/16] %v1615_v19, 128  ;;  %1678 = vst [vmem:[#allocation2 + $0x20] sm:$0xff] %v1620_v42  ;;  %v1621_v50 = vsub.f32 1.0, %v3429_v52  ;;  %v3431_v32 = vpop.eup %3430 }
 0x15d   :  { %v1622_v57 = vsub.f32 1.0, %v3431_v32 }
 0x15e   :  { %1679 = vst [vmem:[#allocation2 + $0x10] sm:$0xff] %v1621_v50 }
 0x15f   :  { %v3433_v49 = vpop.eup %3432  ;;  %1680 = vst [vmem:[#allocation2 + $0x38] sm:$0xff] %v1622_v57 }
 0x160   :  { %1632 = vxpose.xlu0.b32.cont [6/16] %v1616_v53, 128  ;;  %v1623_v4 = vsub.f32 1.0, %v3433_v49  ;;  %v3435_v2 = vpop.eup %3434 }
 0x161   :  { %v1624_v55 = vsub.f32 1.0, %v3435_v2 }
 0x162   :  { %1681 = vst [vmem:[#allocation2 + $0x60] sm:$0xff] %v1623_v4  ;;  %v3437_v45 = vpop.eup %3436 }
 0x163   :  { %1682 = vst [vmem:[#allocation2 + $0x70] sm:$0xff] %v1624_v55  ;;  %v1625_v3 = vsub.f32 1.0, %v3437_v45 }
 0x164   :  { %1633 = vxpose.xlu0.b32.cont [7/16] %v1617_v39, 128 }
 0x165   :  { %v3439_v44 = vpop.eup %3438  ;;  %1683 = vst [vmem:[#allocation2 + $0x78] sm:$0xff] %v1625_v3 }
 0x166   :  { %v1626_v1 = vsub.f32 1.0, %v3439_v44 }
 0x168   :  { %1634 = vxpose.xlu0.b32.cont [8/16] %v1618_v48, 128  ;;  %1684 = vst [vmem:[#allocation2 + $0x28] sm:$0xff] %v1626_v1 }
 0x16c   :  { %1635 = vxpose.xlu0.b32.cont [9/16] %v1619_v13, 128 }
 0x170   :  { %1636 = vxpose.xlu0.b32.cont [10/16] %v1620_v42, 128 }
 0x174   :  { %1637 = vxpose.xlu0.b32.cont [11/16] %v1621_v50, 128 }
 0x178   :  { %1638 = vxpose.xlu0.b32.cont [12/16] %v1622_v57, 128 }
 0x17c   :  { %1639 = vxpose.xlu0.b32.cont [13/16] %v1623_v4, 128 }
 0x180   :  { %1640 = vxpose.xlu0.b32.cont [14/16] %v1624_v55, 128 }
 0x184   :  { %1641 = vxpose.xlu0.b32.cont [15/16] %v1625_v3, 128 }
 0x188   :  { %1642 = vxpose.xlu0.b32.end [16/16] %v1626_v1, 128 }
 0x1c8   :  { %v1643_v5 = vpop.trf.xlu0 }
 0x1c9   :  { %1685 = vst [vmem:[#allocation3 + $0x28] sm:$0xff] %v1643_v5 }
 0x1cc   :  { %v1644_v30 = vpop.trf.xlu0 }
 0x1cd   :  { %1686 = vst [vmem:[#allocation3 + $0x68] sm:$0xff] %v1644_v30 }
 0x1d0   :  { %v1645_v21 = vpop.trf.xlu0 }
 0x1d1   :  { %1687 = vst [vmem:[#allocation3 + $0x10] sm:$0xff] %v1645_v21 }
 0x1d4   :  { %v1646_v56 = vpop.trf.xlu0 }
 0x1d5   :  { %1688 = vst [vmem:[#allocation3 + $0x40] sm:$0xff] %v1646_v56 }
 0x1d8   :  { %v1647_v34 = vpop.trf.xlu0 }
 0x1d9   :  { %1689 = vst [vmem:[#allocation3 + $0x48] sm:$0xff] %v1647_v34 }
 0x1dc   :  { %v1648_v51 = vpop.trf.xlu0 }
 0x1dd   :  { %1690 = vst [vmem:[#allocation3 + $0x30] sm:$0xff] %v1648_v51 }
 0x1e0   :  { %v1649_v47 = vpop.trf.xlu0 }
 0x1e1   :  { %1691 = vst [vmem:[#allocation3 + $0x70] sm:$0xff] %v1649_v47 }
 0x1e4   :  { %v1650_v29 = vpop.trf.xlu0 }
 0x1e5   :  { %1692 = vst [vmem:[#allocation3 + $0x38] sm:$0xff] %v1650_v29 }
 0x1e8   :  { %v1651_v0 = vpop.trf.xlu0 }
 0x1e9   :  { %1693 = vst [vmem:[#allocation3 + $0x20] sm:$0xff] %v1651_v0 }
 0x1ec   :  { %v1652_v23 = vpop.trf.xlu0 }
 0x1ed   :  { %1694 = vst [vmem:[#allocation3 + $0x78] sm:$0xff] %v1652_v23 }
 0x1f0   :  { %v1653_v61 = vpop.trf.xlu0 }
 0x1f1   :  { %1695 = vst [vmem:[#allocation3 + $0x18] sm:$0xff] %v1653_v61 }
 0x1f4   :  { %v1654_v43 = vpop.trf.xlu0 }
 0x1f5   :  { %1696 = vst [vmem:[#allocation3 + $0x58] sm:$0xff] %v1654_v43 }
 0x1f8   :  { %v1655_v63 = vpop.trf.xlu0 }
 0x1f9   :  { %1697 = vst [vmem:[#allocation3] sm:$0xff] %v1655_v63 }
 0x1fc   :  { %v1656_v10 = vpop.trf.xlu0 }
 0x1fd   :  { %1698 = vst [vmem:[#allocation3 + $0x8] sm:$0xff] %v1656_v10 }
 0x200   :  { %v1657_v33 = vpop.trf.xlu0 }
 0x201   :  { %1699 = vst [vmem:[#allocation3 + $0x60] sm:$0xff] %v1657_v33  ;;  %1704 = sbr.rel (%p2739_p3) target bundleno = 544 (0x220), region = 33 }
 0x204   :  { %v1658_v18 = vpop.trf.xlu0 }
 0x205   :  { %1700 = vst [vmem:[#allocation3 + $0x50] sm:$0xff] %v1658_v18 }
 0x206   :  { %v1705_v24 = vlaneseq  ;;  %v1740_v46 = vld [vmem:[#allocation2 + $0x30] sm:$0xff]  ;;  %v1741_v26 = vld [vmem:[#allocation2] sm:$0xff]  ;;  %v1742_v27 = vld [vmem:[#allocation2 + $0x58] sm:$0xff] }
 0x207   :  { %v1743_v7 = vld [vmem:[#allocation2 + $0x18] sm:$0xff]  ;;  %v1744_v14 = vld [vmem:[#allocation2 + $0x50] sm:$0xff]  ;;  %v1745_v9 = vld [vmem:[#allocation2 + $0x68] sm:$0xff] }
 0x208   :  { %v4384_v25 = vshrl.u32 %v1705_v24, 7  ;;  %v4386_v59 = vand.u32 127, %v1705_v24  ;;  %v1746_v58 = vld [vmem:[#allocation2 + $0x8] sm:$0xff]  ;;  %v1748_v31 = vld [vmem:[#allocation2 + $0x40] sm:$0xff]  ;;  %v1750_v38 = vld [vmem:[#allocation2 + $0x10] sm:$0xff] }
 0x209   :  { %v1747_v19 = vld [vmem:[#allocation2 + $0x48] sm:$0xff]  ;;  %v1749_v39 = vld [vmem:[#allocation2 + $0x20] sm:$0xff]  ;;  %v1751_v54 = vld [vmem:[#allocation2 + $0x38] sm:$0xff] }
 0x20a   :  { %vm1724_vm3 = vcmp.eq.s32.totalorder %v4384_v25, %v4386_v59  ;;  %v4391_v60 = vadd.s32 8, %v4384_v25  ;;  %v4394_v28 = vadd.s32 16, %v4384_v25  ;;  %v4397_v16 = vadd.s32 24, %v4384_v25  ;;  %v1752_v48 = vld [vmem:[#allocation2 + $0x60] sm:$0xff]  ;;  %v1753_v52 = vld [vmem:[#allocation2 + $0x70] sm:$0xff]  ;;  %v1754_v50 = vld [vmem:[#allocation2 + $0x78] sm:$0xff] }
 0x20b   :  { %v1756_v17 = vsel %vm1724_vm3, 1.0, %v1740_v46  ;;  %v4403_v62 = vadd.s32 32, %v4384_v25  ;;  %v4406_v11 = vadd.s32 40, %v4384_v25  ;;  %v4409_v40 = vadd.s32 48, %v4384_v25  ;;  %v1755_v32 = vld [vmem:[#allocation2 + $0x28] sm:$0xff]  ;;  %v1790_v45 = vld [vmem:[#allocation3 + $0x10] sm:$0xff] }
 0x20c   :  { %1772 = vst [vmem:[#allocation2 + $0x30] sm:$0xff] %v1756_v17  ;;  %vm1725_vm4 = vcmp.eq.s32.totalorder %v4391_v60, %v4386_v59  ;;  %vm1726_vm5 = vcmp.eq.s32.totalorder %v4394_v28, %v4386_v59  ;;  %vm1727_vm6 = vcmp.eq.s32.totalorder %v4397_v16, %v4386_v59  ;;  %v4418_v35 = vadd.s32 56, %v4384_v25  ;;  %v1788_v2 = vld [vmem:[#allocation3 + $0x28] sm:$0xff]  ;;  %v1791_v44 = vld [vmem:[#allocation3 + $0x40] sm:$0xff]  ;;  %v1793_v5 = vld [vmem:[#allocation3 + $0x30] sm:$0xff] }
 0x20d   :  { %v1757_v22 = vsel %vm1725_vm4, 1.0, %v1741_v26  ;;  %v1758_v53 = vsel %vm1726_vm5, 1.0, %v1742_v27  ;;  %v1759_v37 = vsel %vm1727_vm6, 1.0, %v1743_v7  ;;  %vm1728_vm7 = vcmp.eq.s32.totalorder %v4403_v62, %v4386_v59  ;;  %v1789_v55 = vld [vmem:[#allocation3 + $0x68] sm:$0xff]  ;;  %v1794_v34 = vld [vmem:[#allocation3 + $0x70] sm:$0xff]  ;;  %v1795_v51 = vld [vmem:[#allocation3 + $0x38] sm:$0xff] }
 0x20e   :  { %1773 = vst [vmem:[#allocation2] sm:$0xff] %v1757_v22  ;;  %1774 = vst [vmem:[#allocation2 + $0x58] sm:$0xff] %v1758_v53  ;;  %v1760_v20 = vsel %vm1728_vm7, 1.0, %v1744_v14  ;;  %vm1729_vm8 = vcmp.eq.s32.totalorder %v4406_v11, %v4386_v59  ;;  %vm1730_vm9 = vcmp.eq.s32.totalorder %v4409_v40, %v4386_v59  ;;  %vm1731_vm10 = vcmp.eq.s32.totalorder %v4418_v35, %v4386_v59  ;;  %v1792_v1 = vld [vmem:[#allocation3 + $0x48] sm:$0xff]  ;;  %v1796_v47 = vld [vmem:[#allocation3 + $0x20] sm:$0xff] }
 0x20f   :  { %1775 = vst [vmem:[#allocation2 + $0x18] sm:$0xff] %v1759_v37  ;;  %1776 = vst [vmem:[#allocation2 + $0x50] sm:$0xff] %v1760_v20  ;;  %v1761_v15 = vsel %vm1729_vm8, 1.0, %v1745_v9  ;;  %v1762_v8 = vsel %vm1730_vm9, 1.0, %v1746_v58  ;;  %v1763_v41 = vsel %vm1731_vm10, 1.0, %v1747_v19  ;;  %v4450_v36 = vadd.s32 64, %v4384_v25 }
 0x210   :  { %1777 = vst [vmem:[#allocation2 + $0x68] sm:$0xff] %v1761_v15  ;;  %1778 = vst [vmem:[#allocation2 + $0x8] sm:$0xff] %v1762_v8  ;;  %v4453_v12 = vadd.s32 72, %v4384_v25  ;;  %v4456_v13 = vadd.s32 80, %v4384_v25  ;;  %v4459_v6 = vadd.s32 88, %v4384_v25  ;;  %v4462_v42 = vadd.s32 96, %v4384_v25 }
 0x211   :  { %1779 = vst [vmem:[#allocation2 + $0x48] sm:$0xff] %v1763_v41  ;;  %vm1732_vm11 = vcmp.eq.s32.totalorder %v4450_v36, %v4386_v59  ;;  %v4467_v57 = vadd.s32 104, %v4384_v25  ;;  %v4470_v49 = vadd.s32 112, %v4384_v25  ;;  %v4473_v4 = vadd.s32 120, %v4384_v25  ;;  %v1797_v0 = vld [vmem:[#allocation3 + $0x78] sm:$0xff]  ;;  %v1800_v18 = vld [vmem:[#allocation3] sm:$0xff] }
 0x212   :  { %v1764_v3 = vsel %vm1732_vm11, 1.0, %v1748_v31  ;;  %vm1733_vm12 = vcmp.eq.s32.totalorder %v4453_v12, %v4386_v59  ;;  %vm1734_vm13 = vcmp.eq.s32.totalorder %v4456_v13, %v4386_v59  ;;  %vm1735_vm14 = vcmp.eq.s32.totalorder %v4459_v6, %v4386_v59  ;;  %v1798_v23 = vld [vmem:[#allocation3 + $0x18] sm:$0xff]  ;;  %v1801_v24 = vld [vmem:[#allocation3 + $0x8] sm:$0xff]  ;;  %v1802_v7 = vld [vmem:[#allocation3 + $0x60] sm:$0xff] }
 0x213   :  { %1780 = vst [vmem:[#allocation2 + $0x40] sm:$0xff] %v1764_v3  ;;  %v1765_v30 = vsel %vm1733_vm12, 1.0, %v1749_v39  ;;  %v1766_v21 = vsel %vm1734_vm13, 1.0, %v1750_v38  ;;  %v1767_v56 = vsel %vm1735_vm14, 1.0, %v1751_v54  ;;  %vm1736_vm15 = vcmp.eq.s32.totalorder %v4462_v42, %v4386_v59  ;;  %v1799_v61 = vld [vmem:[#allocation3 + $0x58] sm:$0xff]  ;;  %v1803_v17 = vld [vmem:[#allocation3 + $0x50] sm:$0xff] }
 0x214   :  { %1781 = vst [vmem:[#allocation2 + $0x20] sm:$0xff] %v1765_v30  ;;  %1782 = vst [vmem:[#allocation2 + $0x10] sm:$0xff] %v1766_v21  ;;  %v1768_v29 = vsel %vm1736_vm15, 1.0, %v1752_v48  ;;  %vm1737_vm1 = vcmp.eq.s32.totalorder %v4467_v57, %v4386_v59  ;;  %vm1738_vm2 = vcmp.eq.s32.totalorder %v4470_v49, %v4386_v59  ;;  %vm1739_vm0 = vcmp.eq.s32.totalorder %v4473_v4, %v4386_v59 }
 0x215   :  { %1783 = vst [vmem:[#allocation2 + $0x38] sm:$0xff] %v1767_v56  ;;  %1784 = vst [vmem:[#allocation2 + $0x60] sm:$0xff] %v1768_v29  ;;  %v1769_v43 = vsel %vm1737_vm1, 1.0, %v1753_v52  ;;  %v1770_v63 = vsel %vm1738_vm2, 1.0, %v1754_v50  ;;  %v1771_v10 = vsel %vm1739_vm0, 1.0, %v1755_v32  ;;  %v1804_v33 = vsel %vm1724_vm3, 1.0, %v1788_v2 }
 0x216   :  { %1785 = vst [vmem:[#allocation2 + $0x70] sm:$0xff] %v1769_v43  ;;  %1786 = vst [vmem:[#allocation2 + $0x78] sm:$0xff] %v1770_v63  ;;  %v1805_v46 = vsel %vm1725_vm4, 1.0, %v1789_v55  ;;  %v1806_v26 = vsel %vm1726_vm5, 1.0, %v1790_v45  ;;  %v1807_v27 = vsel %vm1727_vm6, 1.0, %v1791_v44  ;;  %v1808_v25 = vsel %vm1728_vm7, 1.0, %v1792_v1 }
 0x217   :  { %1787 = vst [vmem:[#allocation2 + $0x28] sm:$0xff] %v1771_v10  ;;  %1820 = vst [vmem:[#allocation3 + $0x28] sm:$0xff] %v1804_v33  ;;  %v1809_v60 = vsel %vm1729_vm8, 1.0, %v1793_v5  ;;  %v1810_v28 = vsel %vm1730_vm9, 1.0, %v1794_v34  ;;  %v1811_v16 = vsel %vm1731_vm10, 1.0, %v1795_v51  ;;  %v1812_v62 = vsel %vm1732_vm11, 1.0, %v1796_v47 }
 0x218   :  { %1821 = vst [vmem:[#allocation3 + $0x68] sm:$0xff] %v1805_v46  ;;  %1822 = vst [vmem:[#allocation3 + $0x10] sm:$0xff] %v1806_v26  ;;  %v1813_v14 = vsel %vm1733_vm12, 1.0, %v1797_v0  ;;  %v1814_v11 = vsel %vm1734_vm13, 1.0, %v1798_v23  ;;  %v1815_v40 = vsel %vm1735_vm14, 1.0, %v1799_v61  ;;  %v1816_v9 = vsel %vm1736_vm15, 1.0, %v1800_v18 }
 0x219   :  { %1823 = vst [vmem:[#allocation3 + $0x40] sm:$0xff] %v1807_v27  ;;  %1824 = vst [vmem:[#allocation3 + $0x48] sm:$0xff] %v1808_v25  ;;  %v1817_v58 = vsel %vm1737_vm1, 1.0, %v1801_v24  ;;  %v1818_v35 = vsel %vm1738_vm2, 1.0, %v1802_v7  ;;  %v1819_v19 = vsel %vm1739_vm0, 1.0, %v1803_v17 }
 0x21a   :  { %1825 = vst [vmem:[#allocation3 + $0x30] sm:$0xff] %v1809_v60  ;;  %1826 = vst [vmem:[#allocation3 + $0x70] sm:$0xff] %v1810_v28 }
 0x21b   :  { %1827 = vst [vmem:[#allocation3 + $0x38] sm:$0xff] %v1811_v16  ;;  %1828 = vst [vmem:[#allocation3 + $0x20] sm:$0xff] %v1812_v62 }
 0x21c   :  { %1829 = vst [vmem:[#allocation3 + $0x78] sm:$0xff] %v1813_v14  ;;  %1830 = vst [vmem:[#allocation3 + $0x18] sm:$0xff] %v1814_v11 }
 0x21d   :  { %1831 = vst [vmem:[#allocation3 + $0x58] sm:$0xff] %v1815_v40  ;;  %1832 = vst [vmem:[#allocation3] sm:$0xff] %v1816_v9 }
 0x21e   :  { %1833 = vst [vmem:[#allocation3 + $0x8] sm:$0xff] %v1817_v58  ;;  %1834 = vst [vmem:[#allocation3 + $0x60] sm:$0xff] %v1818_v35 }
 0x21f   :  { %1835 = vst [vmem:[#allocation3 + $0x50] sm:$0xff] %v1819_v19 }
 0x220 PF:  { %s2740_s26 = sshll.u32 %s4828_s0, 7  ;;  %s2741_s28 = sshll.u32 %s4824_s1, 7  ;;  %v1875_v22 = vld [vmem:[#allocation2 + $0x30] sm:$0xff]  ;;  %v1877_v53 = vld [vmem:[#allocation2] sm:$0xff]  ;;  %v1879_v37 = vld [vmem:[#allocation2 + $0x58] sm:$0xff] }
 0x221   :  { %s1838_s10 = sshra.s32 %s2741_s28, 7  ;;  %v1881_v59 = vld [vmem:[#allocation2 + $0x18] sm:$0xff]  ;;  %v1883_v20 = vld [vmem:[#allocation2 + $0x50] sm:$0xff]  ;;  %v1885_v31 = vld [vmem:[#allocation2 + $0x68] sm:$0xff] }
 0x222   :  { %s1840_s14 = sadd.s32 %s2740_s26, %s1838_s10  ;;  %v1887_v39 = vld [vmem:[#allocation2 + $0x8] sm:$0xff]  ;;  %v1891_v15 = vld [vmem:[#allocation2 + $0x40] sm:$0xff]  ;;  %v1895_v41 = vld [vmem:[#allocation2 + $0x10] sm:$0xff] }
 0x223   :  { %v1889_v38 = vld [vmem:[#allocation2 + $0x48] sm:$0xff]  ;;  %s1841_s15 = scalar_lea.vmem %s4827_s9, %s1840_s14  ;;  %v1893_v8 = vld [vmem:[#allocation2 + $0x20] sm:$0xff]  ;;  %v1897_v36 = vld [vmem:[#allocation2 + $0x38] sm:$0xff] }
 0x224   :  { %1876 = vst [vmem:[%s1841_s15] sm:$0xff] %v1875_v22  ;;  %1878 = vst [vmem:[%s1841_s15 + $0x8] sm:$0xff] %v1877_v53  ;;  %v1899_v54 = vld [vmem:[#allocation2 + $0x60] sm:$0xff]  ;;  %v1901_v48 = vld [vmem:[#allocation2 + $0x70] sm:$0xff] }
 0x225   :  { %1880 = vst [vmem:[%s1841_s15 + $0x10] sm:$0xff] %v1879_v37  ;;  %1882 = vst [vmem:[%s1841_s15 + $0x18] sm:$0xff] %v1881_v59  ;;  %v1903_v12 = vld [vmem:[#allocation2 + $0x78] sm:$0xff]  ;;  %v1905_v13 = vld [vmem:[#allocation2 + $0x28] sm:$0xff] }
 0x226   :  { %1884 = vst [vmem:[%s1841_s15 + $0x20] sm:$0xff] %v1883_v20  ;;  %1886 = vst [vmem:[%s1841_s15 + $0x28] sm:$0xff] %v1885_v31 }
 0x227   :  { %1888 = vst [vmem:[%s1841_s15 + $0x30] sm:$0xff] %v1887_v39  ;;  %1890 = vst [vmem:[%s1841_s15 + $0x38] sm:$0xff] %v1889_v38 }
 0x228   :  { %1892 = vst [vmem:[%s1841_s15 + $0x40] sm:$0xff] %v1891_v15  ;;  %1894 = vst [vmem:[%s1841_s15 + $0x48] sm:$0xff] %v1893_v8 }
 0x229   :  { %1896 = vst [vmem:[%s1841_s15 + $0x50] sm:$0xff] %v1895_v41  ;;  %1898 = vst [vmem:[%s1841_s15 + $0x58] sm:$0xff] %v1897_v36 }
 0x22a   :  { %1900 = vst [vmem:[%s1841_s15 + $0x60] sm:$0xff] %v1899_v54  ;;  %1902 = vst [vmem:[%s1841_s15 + $0x68] sm:$0xff] %v1901_v48 }
 0x22b   :  { %1904 = vst [vmem:[%s1841_s15 + $0x70] sm:$0xff] %v1903_v12  ;;  %1906 = vst [vmem:[%s1841_s15 + $0x78] sm:$0xff] %v1905_v13 }
 0x22c   :  { %1914 = vsyncadd [#allocation4], 2048  ;;  %s1915_s18 = sshra.s32 %s2740_s26, 7  ;;  %v1953_v6 = vld [vmem:[#allocation3 + $0x28] sm:$0xff]  ;;  %v1957_v52 = vld [vmem:[#allocation3 + $0x10] sm:$0xff] }
 0x22d   :  { %v1955_v42 = vld [vmem:[#allocation3 + $0x68] sm:$0xff]  ;;  %s1917_s20 = sadd.s32 %s2741_s28, %s1915_s18  ;;  %v1959_v50 = vld [vmem:[#allocation3 + $0x40] sm:$0xff]  ;;  %v1963_v57 = vld [vmem:[#allocation3 + $0x30] sm:$0xff] }
 0x22e   :  { %v1961_v32 = vld [vmem:[#allocation3 + $0x48] sm:$0xff]  ;;  %s1918_s23 = scalar_lea.vmem %s4827_s9, %s1917_s20  ;;  %v1965_v49 = vld [vmem:[#allocation3 + $0x70] sm:$0xff]  ;;  %v1967_v4 = vld [vmem:[#allocation3 + $0x38] sm:$0xff] }
 0x22f   :  { %1954 = vst [vmem:[%s1918_s23] sm:$0xff] %v1953_v6  ;;  %1956 = vst [vmem:[%s1918_s23 + $0x8] sm:$0xff] %v1955_v42  ;;  %v1969_v2 = vld [vmem:[#allocation3 + $0x20] sm:$0xff]  ;;  %v1971_v55 = vld [vmem:[#allocation3 + $0x78] sm:$0xff] }
 0x230   :  { %1958 = vst [vmem:[%s1918_s23 + $0x10] sm:$0xff] %v1957_v52  ;;  %1960 = vst [vmem:[%s1918_s23 + $0x18] sm:$0xff] %v1959_v50  ;;  %v1973_v45 = vld [vmem:[#allocation3 + $0x18] sm:$0xff]  ;;  %v1977_v44 = vld [vmem:[#allocation3] sm:$0xff] }
 0x231   :  { %1962 = vst [vmem:[%s1918_s23 + $0x20] sm:$0xff] %v1961_v32  ;;  %1964 = vst [vmem:[%s1918_s23 + $0x28] sm:$0xff] %v1963_v57  ;;  %v1975_v3 = vld [vmem:[#allocation3 + $0x58] sm:$0xff]  ;;  %v1979_v1 = vld [vmem:[#allocation3 + $0x8] sm:$0xff] }
 0x232   :  { %1966 = vst [vmem:[%s1918_s23 + $0x30] sm:$0xff] %v1965_v49  ;;  %1968 = vst [vmem:[%s1918_s23 + $0x38] sm:$0xff] %v1967_v4  ;;  %v1981_v5 = vld [vmem:[#allocation3 + $0x60] sm:$0xff]  ;;  %v1983_v30 = vld [vmem:[#allocation3 + $0x50] sm:$0xff] }
 0x233   :  { %1970 = vst [vmem:[%s1918_s23 + $0x40] sm:$0xff] %v1969_v2  ;;  %1972 = vst [vmem:[%s1918_s23 + $0x48] sm:$0xff] %v1971_v55 }
 0x234   :  { %1974 = vst [vmem:[%s1918_s23 + $0x50] sm:$0xff] %v1973_v45  ;;  %1976 = vst [vmem:[%s1918_s23 + $0x58] sm:$0xff] %v1975_v3 }
 0x235   :  { %1978 = vst [vmem:[%s1918_s23 + $0x60] sm:$0xff] %v1977_v44  ;;  %1980 = vst [vmem:[%s1918_s23 + $0x68] sm:$0xff] %v1979_v1 }
 0x236   :  { %1982 = vst [vmem:[%s1918_s23 + $0x70] sm:$0xff] %v1981_v5  ;;  %1984 = vst [vmem:[%s1918_s23 + $0x78] sm:$0xff] %v1983_v30 }
 0x237   :  { %1992 = vsyncadd [#allocation4 + $0x1], 2048  ;;  %1995 = sbr.rel (%p2739_p3) target bundleno = 997 (0x3e5), region = 105 }
 0x23c   :  { %v3449_v21 = vmov 0.0   ;;  %v5031_v56 = vld [vmem:[#allocation63_spill] sm:$0xff]  ;;  %v5032_v34 = vld [vmem:[#allocation76_spill] sm:$0xff]  ;;  %vm3450_vm0 = vmmov 0   ;;  %v5036_v0 = vld [vmem:[#allocation74_spill] sm:$0xff]  ;;  %vm5053_vm3 = vcmask 261120  }
 0x23d   :  { %3159 = vmatprep.subr.mxu0 %v3449_v21  ;;  %3194 = vmatprep.subr.mxu1 %v3449_v21  ;;  %v5033_v51 = vld [vmem:[#allocation60_spill] sm:$0xff]  ;;  %v5034_v47 = vld [vmem:[#allocation75_spill] sm:$0xff]  ;;  %v5037_v23 = vld [vmem:[#allocation58_spill] sm:$0xff] }
 0x23e   :  { %3160 = vmatpush3.xpose.msra.mxu0 %v5031_v56  ;;  %3195 = vmatpush3.xpose.msra.mxu1 %v5032_v34  ;;  %v5035_v29 = vld [vmem:[#allocation59_spill] sm:$0xff]  ;;  %v5038_v61 = vld [vmem:[#allocation73_spill] sm:$0xff]  ;;  %v5039_v43 = vld [vmem:[#allocation50_spill] sm:$0xff] }
 0x23f   :  { %3161 = vmatprep.subr.mxu0 %v3449_v21  ;;  %3196 = vmatprep.subr.mxu1 %v3449_v21  ;;  %v5040_v63 = vld [vmem:[#allocation71_spill] sm:$0xff]  ;;  %v5041_v10 = vld [vmem:[#allocation42_spill] sm:$0xff]  ;;  %v5043_v18 = vld [vmem:[#allocation41_spill] sm:$0xff] }
 0x240   :  { %3191 = vmatprep.mubr.msk.f32.mxu0 %vm3450_vm0, %v3449_v21  ;;  %3226 = vmatprep.mubr.msk.f32.mxu1 %vm3450_vm0, %v3449_v21  ;;  %v5042_v33 = vld [vmem:[#allocation66_spill] sm:$0xff]  ;;  %v5044_v24 = vld [vmem:[#allocation64_spill] sm:$0xff]  ;;  %v5047_v27 = vld [vmem:[#allocation33_spill] sm:$0xff] }
 0x241   :  { %v5045_v46 = vld [vmem:[#allocation34_spill] sm:$0xff]  ;;  %v5046_v26 = vld [vmem:[#allocation56_spill] sm:$0xff]  ;;  %v5048_v25 = vld [vmem:[#allocation55_spill] sm:$0xff] }
 0x242   :  { %3162 = vmatpush3.xpose.msra.mxu0 %v5033_v51  ;;  %3197 = vmatpush3.xpose.msra.mxu1 %v5034_v47  ;;  %v5049_v7 = vld [vmem:[#allocation32_spill] sm:$0xff]  ;;  %v5050_v17 = vld [vmem:[#allocation53_spill] sm:$0xff]  ;;  %v5054_v11 = vld [vmem:[#allocation27_spill] sm:$0xff] }
 0x243   :  { %3163 = vmatprep.subr.mxu0 %v3449_v21  ;;  %3198 = vmatprep.subr.mxu1 %v3449_v21  ;;  %v1996_v60 = vld [vmem:[%s4825_s6] sm:$0x1]  ;;  %v5052_v16 = vld [vmem:[#allocation49_spill] sm:$0xff]  ;;  %v5057_v35 = vld [vmem:[#allocation35_spill] sm:$0xff] }
 0x244   :  { %v5051_v28 = vld [vmem:[#allocation28_spill] sm:$0xff]  ;;  %v2001_v62 = vsel %vm5053_vm3, %v1996_v60, 0  ;;  %v5056_v58 = vld [vmem:[#allocation21_spill] sm:$0xff]  ;;  %v5060_v59 = vld [vmem:[#allocation14_spill] sm:$0xff] }
 0x245   :  { %v4650_v14 = vand.u32 4294901760, %v2001_v62  ;;  %v5055_v40 = vld [vmem:[#allocation48_spill] sm:$0xff]  ;;  %v5059_v53 = vld [vmem:[#allocation29_spill] sm:$0xff]  ;;  %v5066_v36 = vld [vmem:[#allocation62_spill] sm:$0xff] }
 0x246   :  { %3164 = vmatpush3.xpose.msra.mxu0 %v5035_v29  ;;  %3199 = vmatpush3.xpose.msra.mxu1 %v5036_v0  ;;  %v5058_v22 = vld [vmem:[#allocation16_spill] sm:$0xff]  ;;  %v5061_v20 = vld [vmem:[#allocation25_spill] sm:$0xff]  ;;  %v5068_v48 = vld [vmem:[#allocation54_spill] sm:$0xff] }
 0x247   :  { %3165 = vmatprep.subr.mxu0 %v3449_v21  ;;  %3200 = vmatprep.subr.mxu1 %v3449_v21  ;;  %v4657_v9 = vsub.f32 %v2001_v62, %v4650_v14  ;;  %v5062_v39 = vld [vmem:[#allocation13_spill] sm:$0xff]  ;;  %v5063_v38 = vld [vmem:[#allocation24_spill] sm:$0xff]  ;;  %v5069_v12 = vld [vmem:[#allocation47_spill] sm:$0xff] }
 0x248   :  { %v1997_v15 = vld [vmem:[#allocation8] sm:$0x1]  ;;  %v5064_v8 = vld [vmem:[#allocation69_spill] sm:$0xff]  ;;  %v5070_v13 = vld [vmem:[#allocation46_spill] sm:$0xff] }
 0x249   :  { %v2086_v19 = vand.u32 4294901760, %v4657_v9  ;;  %3369 = vpush %v1997_v15  ;;  %v5065_v41 = vld [vmem:[#allocation65_spill] sm:$0xff]  ;;  %v5071_v6 = vld [vmem:[#allocation40_spill] sm:$0xff]  ;;  %v5072_v42 = vld [vmem:[#allocation39_spill] sm:$0xff] }
 0x24a   :  { %3166 = vmatpush3.xpose.msra.mxu0 %v5037_v23  ;;  %3201 = vmatpush3.xpose.msra.mxu1 %v5038_v61  ;;  %v5067_v54 = vld [vmem:[#allocation61_spill] sm:$0xff]  ;;  %v5073_v52 = vld [vmem:[#allocation38_spill] sm:$0xff]  ;;  %v5074_v50 = vld [vmem:[#allocation31_spill] sm:$0xff] }
 0x24b   :  { %3167 = vmatprep.subr.mxu0 %v3449_v21  ;;  %3202 = vmatprep.subr.mxu1 %v3449_v21  ;;  %v2087_v37 = vsub.f32 %v4657_v9, %v2086_v19  ;;  %v5075_v32 = vld [vmem:[#allocation30_spill] sm:$0xff]  ;;  %v5076_v57 = vld [vmem:[#allocation23_spill] sm:$0xff]  ;;  %v5078_v4 = vld [vmem:[#allocation17_spill] sm:$0xff] }
 0x24c   :  { %v5077_v49 = vld [vmem:[#allocation19_spill] sm:$0xff]  ;;  %v5080_v55 = vld [vmem:[#allocation72_spill] sm:$0xff]  ;;  %v5081_v45 = vld [vmem:[#allocation70_spill] sm:$0xff] }
 0x24d   :  { %v2088_v31 = vand.u32 4294901760, %v2087_v37  ;;  %v5079_v2 = vld [vmem:[#allocation15_spill] sm:$0xff]  ;;  %v5082_v3 = vld [vmem:[#allocation68_spill] sm:$0xff]  ;;  %v5084_v1 = vld [vmem:[#allocation57_spill] sm:$0xff] }
 0x24e   :  { %3168 = vmatpush3.xpose.msra.mxu0 %v5039_v43  ;;  %3203 = vmatpush3.xpose.msra.mxu1 %v5040_v63  ;;  %v5083_v44 = vld [vmem:[#allocation67_spill] sm:$0xff]  ;;  %v5085_v5 = vld [vmem:[#allocation52_spill] sm:$0xff]  ;;  %v5090_v47 = vld [vmem:[#allocation37_spill] sm:$0xff] }
 0x24f   :  { %3169 = vmatprep.subr.mxu0 %v3449_v21  ;;  %3204 = vmatprep.subr.mxu1 %v3449_v21  ;;  %v5086_v30 = vld [vmem:[#allocation51_spill] sm:$0xff]  ;;  %v5088_v34 = vld [vmem:[#allocation44_spill] sm:$0xff]  ;;  %v5092_v0 = vld [vmem:[#allocation26_spill] sm:$0xff] }
 0x250   :  { %v5094_v61 = vld [vmem:[#allocation20_spill] sm:$0xff] }
 0x252   :  { %3170 = vmatpush3.xpose.msra.mxu0 %v5041_v10  ;;  %3205 = vmatpush3.xpose.msra.mxu1 %v5042_v33 }
 0x253   :  { %3171 = vmatprep.subr.mxu0 %v3449_v21  ;;  %3206 = vmatprep.subr.mxu1 %v3449_v21 }
 0x256   :  { %3172 = vmatpush3.xpose.msra.mxu0 %v5043_v18  ;;  %3207 = vmatpush3.xpose.msra.mxu1 %v5044_v24 }
 0x257   :  { %3173 = vmatprep.subr.mxu0 %v3449_v21  ;;  %3208 = vmatprep.subr.mxu1 %v3449_v21 }
 0x25a   :  { %3174 = vmatpush3.xpose.msra.mxu0 %v5045_v46  ;;  %3209 = vmatpush3.xpose.msra.mxu1 %v5046_v26 }
 0x25b   :  { %3175 = vmatprep.subr.mxu0 %v3449_v21  ;;  %3210 = vmatprep.subr.mxu1 %v3449_v21 }
 0x25e   :  { %3176 = vmatpush3.xpose.msra.mxu0 %v5047_v27  ;;  %3211 = vmatpush3.xpose.msra.mxu1 %v5048_v25 }
 0x25f   :  { %3177 = vmatprep.subr.mxu0 %v3449_v21  ;;  %3212 = vmatprep.subr.mxu1 %v3449_v21 }
 0x262   :  { %3178 = vmatpush3.xpose.msra.mxu0 %v5049_v7  ;;  %3213 = vmatpush3.xpose.msra.mxu1 %v5050_v17 }
 0x263   :  { %3179 = vmatprep.subr.mxu0 %v3449_v21  ;;  %3214 = vmatprep.subr.mxu1 %v3449_v21 }
 0x266   :  { %3180 = vmatpush3.xpose.msra.mxu0 %v5051_v28  ;;  %3215 = vmatpush3.xpose.msra.mxu1 %v5052_v16 }
 0x267   :  { %3181 = vmatprep.subr.mxu0 %v3449_v21  ;;  %3216 = vmatprep.subr.mxu1 %v3449_v21 }
 0x26a   :  { %3182 = vmatpush3.xpose.msra.mxu0 %v5054_v11  ;;  %3217 = vmatpush3.xpose.msra.mxu1 %v5055_v40 }
 0x26b   :  { %3183 = vmatprep.subr.mxu0 %v3449_v21  ;;  %3218 = vmatprep.subr.mxu1 %v3449_v21 }
 0x26e   :  { %3184 = vmatpush3.xpose.msra.mxu0 %v5056_v58  ;;  %3219 = vmatpush3.xpose.msra.mxu1 %v5057_v35 }
 0x26f   :  { %3185 = vmatprep.subr.mxu0 %v3449_v21  ;;  %3220 = vmatprep.subr.mxu1 %v3449_v21 }
 0x272   :  { %3186 = vmatpush3.xpose.msra.mxu0 %v5058_v22  ;;  %3221 = vmatpush3.xpose.msra.mxu1 %v5059_v53 }
 0x273   :  { %3187 = vmatprep.subr.mxu0 %v3449_v21  ;;  %3222 = vmatprep.subr.mxu1 %v3449_v21 }
 0x276   :  { %3188 = vmatpush3.xpose.msra.mxu0 %v5060_v59  ;;  %3223 = vmatpush3.xpose.msra.mxu1 %v5061_v20 }
 0x277   :  { %3189 = vmatprep.subr.mxu0 %v3449_v21  ;;  %3224 = vmatprep.subr.mxu1 %v3449_v21 }
 0x27a   :  { %3190 = vmatpush3.xpose.msra.mxu0 %v5062_v39  ;;  %3225 = vmatpush3.xpose.msra.mxu1 %v5063_v38  ;;  %s3370_s6 = spop %3369 }
 0x27b   :  { %3229 = vmatprep.subr.mxu0 %v3449_v21  ;;  %3264 = vmatprep.subr.mxu1 %v3449_v21  ;;  %v1999_v63 = vstv %s3370_s6 }
 0x27d   :  { %3192 = vmatmul.mubr.f32.vlgmr.msra.gmra.mxu0 %v2088_v31  ;;  %3227 = vmatmul.mubr.f32.vlgmr.msra.gmra.mxu1 %v4650_v14 }
 0x27e   :  { %3230 = vmatpush3.xpose.msra.mxu0 %v5064_v8  ;;  %3265 = vmatpush3.xpose.msra.mxu1 %v5031_v56 }
 0x27f   :  { %3231 = vmatprep.subr.mxu0 %v3449_v21  ;;  %3266 = vmatprep.subr.mxu1 %v3449_v21 }
 0x280   :  { %3261 = vmatprep.mubr.msk.f32.mxu0 %vm3450_vm0, %v3449_v21  ;;  %3296 = vmatprep.mubr.msk.f32.mxu1 %vm3450_vm0, %v3449_v21 }
 0x282   :  { %3232 = vmatpush3.xpose.msra.mxu0 %v5065_v41  ;;  %3267 = vmatpush3.xpose.msra.mxu1 %v5033_v51 }
 0x283   :  { %3233 = vmatprep.subr.mxu0 %v3449_v21  ;;  %3268 = vmatprep.subr.mxu1 %v3449_v21 }
 0x286   :  { %3234 = vmatpush3.xpose.msra.mxu0 %v5066_v36  ;;  %3269 = vmatpush3.xpose.msra.mxu1 %v5035_v29 }
 0x287   :  { %3235 = vmatprep.subr.mxu0 %v3449_v21  ;;  %3270 = vmatprep.subr.mxu1 %v3449_v21 }
 0x28a   :  { %3236 = vmatpush3.xpose.msra.mxu0 %v5067_v54  ;;  %3271 = vmatpush3.xpose.msra.mxu1 %v5037_v23 }
 0x28b   :  { %3237 = vmatprep.subr.mxu0 %v3449_v21  ;;  %3272 = vmatprep.subr.mxu1 %v3449_v21 }
 0x28e   :  { %3238 = vmatpush3.xpose.msra.mxu0 %v5068_v48  ;;  %3273 = vmatpush3.xpose.msra.mxu1 %v5039_v43 }
 0x28f   :  { %3239 = vmatprep.subr.mxu0 %v3449_v21  ;;  %3274 = vmatprep.subr.mxu1 %v3449_v21 }
 0x292   :  { %3240 = vmatpush3.xpose.msra.mxu0 %v5069_v12  ;;  %3275 = vmatpush3.xpose.msra.mxu1 %v5041_v10 }
 0x293   :  { %3241 = vmatprep.subr.mxu0 %v3449_v21  ;;  %3276 = vmatprep.subr.mxu1 %v3449_v21 }
 0x296   :  { %3242 = vmatpush3.xpose.msra.mxu0 %v5070_v13  ;;  %3277 = vmatpush3.xpose.msra.mxu1 %v5043_v18 }
 0x297   :  { %3243 = vmatprep.subr.mxu0 %v3449_v21  ;;  %3278 = vmatprep.subr.mxu1 %v3449_v21 }
 0x29a   :  { %3244 = vmatpush3.xpose.msra.mxu0 %v5071_v6  ;;  %3279 = vmatpush3.xpose.msra.mxu1 %v5045_v46 }
 0x29b   :  { %3245 = vmatprep.subr.mxu0 %v3449_v21  ;;  %3280 = vmatprep.subr.mxu1 %v3449_v21 }
 0x29e   :  { %3246 = vmatpush3.xpose.msra.mxu0 %v5072_v42  ;;  %3281 = vmatpush3.xpose.msra.mxu1 %v5047_v27 }
 0x29f   :  { %3247 = vmatprep.subr.mxu0 %v3449_v21  ;;  %3282 = vmatprep.subr.mxu1 %v3449_v21 }
 0x2a2   :  { %3248 = vmatpush3.xpose.msra.mxu0 %v5073_v52  ;;  %3283 = vmatpush3.xpose.msra.mxu1 %v5049_v7 }
 0x2a3   :  { %3249 = vmatprep.subr.mxu0 %v3449_v21  ;;  %3284 = vmatprep.subr.mxu1 %v3449_v21 }
 0x2a6   :  { %3250 = vmatpush3.xpose.msra.mxu0 %v5074_v50  ;;  %3285 = vmatpush3.xpose.msra.mxu1 %v5051_v28 }
 0x2a7   :  { %3251 = vmatprep.subr.mxu0 %v3449_v21  ;;  %3286 = vmatprep.subr.mxu1 %v3449_v21 }
 0x2aa   :  { %3252 = vmatpush3.xpose.msra.mxu0 %v5075_v32  ;;  %3287 = vmatpush3.xpose.msra.mxu1 %v5054_v11 }
 0x2ab   :  { %3253 = vmatprep.subr.mxu0 %v3449_v21  ;;  %3288 = vmatprep.subr.mxu1 %v3449_v21 }
 0x2ae   :  { %3254 = vmatpush3.xpose.msra.mxu0 %v5076_v57  ;;  %3289 = vmatpush3.xpose.msra.mxu1 %v5056_v58 }
 0x2af   :  { %3255 = vmatprep.subr.mxu0 %v3449_v21  ;;  %3290 = vmatprep.subr.mxu1 %v3449_v21 }
 0x2b2   :  { %3256 = vmatpush3.xpose.msra.mxu0 %v5077_v49  ;;  %3291 = vmatpush3.xpose.msra.mxu1 %v5058_v22 }
 0x2b3   :  { %3257 = vmatprep.subr.mxu0 %v3449_v21  ;;  %3292 = vmatprep.subr.mxu1 %v3449_v21 }
 0x2b6   :  { %3258 = vmatpush3.xpose.msra.mxu0 %v5078_v4  ;;  %3293 = vmatpush3.xpose.msra.mxu1 %v5060_v59 }
 0x2b7   :  { %3259 = vmatprep.subr.mxu0 %v3449_v21  ;;  %3294 = vmatprep.subr.mxu1 %v3449_v21 }
 0x2ba   :  { %3260 = vmatpush3.xpose.msra.mxu0 %v5079_v2  ;;  %3295 = vmatpush3.xpose.msra.mxu1 %v5062_v39 }
 0x2bb   :  { %3299 = vmatprep.subr.mxu0 %v3449_v21  ;;  %3334 = vmatprep.subr.mxu1 %v3449_v21 }
 0x2bd   :  { %3262 = vmatmul.mubr.f32.vlgmr.msra.gmra.mxu0 %v4657_v9  ;;  %3297 = vmatmul.mubr.f32.vlgmr.msra.gmra.mxu1 %v2086_v19 }
 0x2be   :  { %3300 = vmatpush3.xpose.msra.mxu0 %v5080_v55  ;;  %3335 = vmatpush3.xpose.msra.mxu1 %v5031_v56  ;;  %v5087_v56 = vld [vmem:[#allocation45_spill] sm:$0xff] }
 0x2bf   :  { %3301 = vmatprep.subr.mxu0 %v3449_v21  ;;  %3336 = vmatprep.subr.mxu1 %v3449_v21 }
 0x2c0   :  { %3331 = vmatprep.mubr.msk.f32.mxu0 %vm3450_vm0, %v3449_v21  ;;  %3366 = vmatprep.mubr.msk.f32.mxu1 %vm3450_vm0, %v3449_v21 }
 0x2c2   :  { %3302 = vmatpush3.xpose.msra.mxu0 %v5081_v45  ;;  %3337 = vmatpush3.xpose.msra.mxu1 %v5033_v51  ;;  %v5089_v51 = vld [vmem:[#allocation43_spill] sm:$0xff] }
 0x2c3   :  { %3303 = vmatprep.subr.mxu0 %v3449_v21  ;;  %3338 = vmatprep.subr.mxu1 %v3449_v21 }
 0x2c6   :  { %3304 = vmatpush3.xpose.msra.mxu0 %v5082_v3  ;;  %3339 = vmatpush3.xpose.msra.mxu1 %v5035_v29  ;;  %v5091_v29 = vld [vmem:[#allocation36_spill] sm:$0xff] }
 0x2c7   :  { %3305 = vmatprep.subr.mxu0 %v3449_v21  ;;  %3340 = vmatprep.subr.mxu1 %v3449_v21 }
 0x2ca   :  { %3306 = vmatpush3.xpose.msra.mxu0 %v5083_v44  ;;  %3341 = vmatpush3.xpose.msra.mxu1 %v5037_v23  ;;  %v5093_v23 = vld [vmem:[#allocation22_spill] sm:$0xff] }
 0x2cb   :  { %3307 = vmatprep.subr.mxu0 %v3449_v21  ;;  %3342 = vmatprep.subr.mxu1 %v3449_v21 }
 0x2ce   :  { %3308 = vmatpush3.xpose.msra.mxu0 %v5084_v1  ;;  %3343 = vmatpush3.xpose.msra.mxu1 %v5039_v43  ;;  %v5095_v43 = vld [vmem:[#allocation18_spill] sm:$0xff] }
 0x2cf   :  { %3309 = vmatprep.subr.mxu0 %v3449_v21  ;;  %3344 = vmatprep.subr.mxu1 %v3449_v21 }
 0x2d2   :  { %3310 = vmatpush3.xpose.msra.mxu0 %v5085_v5  ;;  %3345 = vmatpush3.xpose.msra.mxu1 %v5041_v10 }
 0x2d3   :  { %3311 = vmatprep.subr.mxu0 %v3449_v21  ;;  %3346 = vmatprep.subr.mxu1 %v3449_v21 }
 0x2d6   :  { %3312 = vmatpush3.xpose.msra.mxu0 %v5086_v30  ;;  %3347 = vmatpush3.xpose.msra.mxu1 %v5043_v18 }
 0x2d7   :  { %3313 = vmatprep.subr.mxu0 %v3449_v21  ;;  %3348 = vmatprep.subr.mxu1 %v3449_v21 }
 0x2da   :  { %3314 = vmatpush3.xpose.msra.mxu0 %v5087_v56  ;;  %3349 = vmatpush3.xpose.msra.mxu1 %v5045_v46 }
 0x2db   :  { %3315 = vmatprep.subr.mxu0 %v3449_v21  ;;  %3350 = vmatprep.subr.mxu1 %v3449_v21 }
 0x2de   :  { %3316 = vmatpush3.xpose.msra.mxu0 %v5088_v34  ;;  %3351 = vmatpush3.xpose.msra.mxu1 %v5047_v27 }
 0x2df   :  { %3317 = vmatprep.subr.mxu0 %v3449_v21  ;;  %3352 = vmatprep.subr.mxu1 %v3449_v21 }
 0x2e2   :  { %3318 = vmatpush3.xpose.msra.mxu0 %v5089_v51  ;;  %3353 = vmatpush3.xpose.msra.mxu1 %v5049_v7 }
 0x2e3   :  { %3319 = vmatprep.subr.mxu0 %v3449_v21  ;;  %3354 = vmatprep.subr.mxu1 %v3449_v21 }
 0x2e6   :  { %3320 = vmatpush3.xpose.msra.mxu0 %v5090_v47  ;;  %3355 = vmatpush3.xpose.msra.mxu1 %v5051_v28 }
 0x2e7   :  { %3321 = vmatprep.subr.mxu0 %v3449_v21  ;;  %3356 = vmatprep.subr.mxu1 %v3449_v21 }
 0x2ea   :  { %3322 = vmatpush3.xpose.msra.mxu0 %v5091_v29  ;;  %3357 = vmatpush3.xpose.msra.mxu1 %v5054_v11 }
 0x2eb   :  { %3323 = vmatprep.subr.mxu0 %v3449_v21  ;;  %3358 = vmatprep.subr.mxu1 %v3449_v21 }
 0x2ee   :  { %3324 = vmatpush3.xpose.msra.mxu0 %v5092_v0  ;;  %3359 = vmatpush3.xpose.msra.mxu1 %v5056_v58 }
 0x2ef   :  { %3325 = vmatprep.subr.mxu0 %v3449_v21  ;;  %3360 = vmatprep.subr.mxu1 %v3449_v21 }
 0x2f2   :  { %3326 = vmatpush3.xpose.msra.mxu0 %v5093_v23  ;;  %3361 = vmatpush3.xpose.msra.mxu1 %v5058_v22 }
 0x2f3   :  { %3327 = vmatprep.subr.mxu0 %v3449_v21  ;;  %3362 = vmatprep.subr.mxu1 %v3449_v21 }
 0x2f6   :  { %3328 = vmatpush3.xpose.msra.mxu0 %v5094_v61  ;;  %3363 = vmatpush3.xpose.msra.mxu1 %v5060_v59 }
 0x2f7   :  { %3329 = vmatprep.subr.mxu0 %v3449_v21  ;;  %3364 = vmatprep.subr.mxu1 %v3449_v21 }
 0x2fa   :  { %3330 = vmatpush3.xpose.msra.mxu0 %v5095_v43  ;;  %3365 = vmatpush3.xpose.msra.mxu1 %v5062_v39 }
 0x2fd   :  { %3332 = vmatmul.mubr.f32.vlgmr.msra.gmra.mxu0 %v4650_v14  ;;  %3367 = vmatmul.mubr.f32.vlgmr.msra.gmra.mxu1 %v4650_v14 }
 0x33d   :  { %v2090_v10 = vpop.f32.mrf.mxu0  ;;  %v2241_v33 = vpop.f32.mrf.mxu1 }
 0x33e   :  { %v2091_v18 = vadd.f32 %v2090_v10, %v1999_v63 }
 0x33f   :  { %v3193_v24 = vpop.f32.mrf.mxu0  ;;  %v3228_v46 = vpop.f32.mrf.mxu1 }
 0x340   :  { %v2242_v26 = vadd.f32 %v2241_v33, %v2091_v18 }
 0x37d   :  { %v2345_v27 = vpop.f32.mrf.mxu0  ;;  %v2434_v25 = vpop.f32.mrf.mxu1 }
 0x37e   :  { %v2346_v17 = vadd.f32 %v2345_v27, %v2242_v26 }
 0x37f   :  { %v3263_v7 = vpop.f32.mrf.mxu0  ;;  %v3298_v21 = vpop.f32.mrf.mxu1 }
 0x380   :  { %v2435_v60 = vadd.f32 %v2434_v25, %v2346_v17 }
 0x3bd   :  { %v2553_v28 = vpop.f32.mrf.mxu0  ;;  %v2640_v16 = vpop.f32.mrf.mxu1 }
 0x3be   :  { %v2554_v62 = vadd.f32 %v2553_v28, %v2435_v60 }
 0x3bf   :  { %v3333_v11 = vpop.f32.mrf.mxu0  ;;  %v3368_v14 = vpop.f32.mrf.mxu1 }
 0x3c0   :  { %v2641_v40 = vadd.f32 %v2640_v16, %v2554_v62 }
 0x3c2   :  { %v2644_v9 = vsub.f32 0.0, %v2641_v40 }
 0x3c4   :  { %v2645_v58 = vmul.f32 1.442695, %v2644_v9 }
 0x3c6   :  { %3440 = vpow2.f32 %v2645_v58 }
 0x3d3   :  { %v3441_v35 = vpop.eup %3440 }
 0x3d4   :  { %v2647_v19 = vadd.f32 1.0, %v3441_v35 }
 0x3d6   :  { %3442 = vrcp.f32 %v2647_v19 }
 0x3e3   :  { %v3443_v22 = vpop.eup %3442 }
 0x3e4   :  { %2650 = vst [vmem:[%s113_s12] sm:$0x1] %v3443_v22 }
 0x3e5 PF:  { %3444 = dma.done.wait [#allocation4], 2048 }
 0x3e6   :  { %3445 = vsyncadd [#allocation4], 4294965248 }
 0x3e7   :  { %3446 = dma.done.wait [#allocation4 + $0x1], 2048 }
 0x3e8   :  { %3447 = vsyncadd [#allocation4 + $0x1], 4294965248 }
 0x3e9   :  { %2673 = vsyncmov [#allocation4] }
 0x3ec   :  { %s2674_s28 = vpop.sfrf %2673 }
 0x3ed   :  { %p2743_p4 = scmp.ne.s32.totalorder %s2674_s28, 0 }
 0x3ef   :  { %2678 = shalt.err (%p2743_p4)  }
 0x3f0   :  { %2680 = vsyncmov [#allocation4 + $0x1] }
 0x3f3   :  { %s2681_s29 = vpop.sfrf %2680 }
 0x3f4   :  { %p2744_p5 = scmp.ne.s32.totalorder %s2681_s29, 0 }
 0x3f6   :  { %2685 = shalt.err (%p2744_p5)  }

</bundles_post_ra>
